<compile_context>
chip_gen: v7x
topology: tpu7x:2x2x1
jax: 0.10.0
libtpu: 0.0.40
codegen_flags: <defaults>
</compile_context>

<pallas_src>
import jax
import jax.numpy as jnp
from jax.experimental import pallas as pl
from jax.experimental.pallas import tpu as pltpu

COM = 5      # com_size
INP = 5      # input_size
LAYER = 25   # layer_size
OUT = 5      # output_size
LANES = 128  # lane width of the packed parameter slab


def _build_layout(align=8):
    """Row layout of the packed parameter slab: name -> (row0, nrows, ncols).
    Each piece starts on an 8-row (sublane-tile) boundary."""
    layout = {}
    row = 0

    def add(name, nrows, ncols):
        nonlocal row
        layout[name] = (row, nrows, ncols)
        row += -(-nrows // align) * align

    add("a1_w1_com", COM, LAYER)     # W1 rows hit by agent 1's avg-com input
    add("a2_w1_com", COM, LAYER)     # W1 rows hit by agent 2's avg-com input
    add("a1_w2_out", LAYER, OUT)     # agent 1 W2, output columns
    add("a1_w2_com", LAYER, COM)     # agent 1 W2, com columns
    add("a2_w2", LAYER, OUT + COM)   # agent 2 W2, fused (out | com) columns
    add("biases", 3, OUT + COM)      # row0: a1_b2_out, row1: a1_b2_com, row2: a2_b2
    nrows = -(-row // align) * align
    return layout, nrows


_LAYOUT, _SLAB_ROWS = _build_layout()


def pack_weights(params):
    """One-time preprocessing (outside the hot path).

    Returns:
      w_slab: (_SLAB_ROWS, 128) f32 lane-dense slab with everything the kernel
              needs (com-facing W1 rows, W2 blocks, second-layer biases).
      in_w:   (2, INP, LAYER) first-layer weight rows hit by the fixed inputs.
      in_b:   (2, LAYER)      first-layer biases.
    in_w/in_b stay outside the kernel: the wrapper hoists I[0] @ W1_in + b1.
    """
    a1w1, a1b1, a1w2, a1b2, a2w1, a2b1, a2w2, a2b2 = params
    slab = jnp.zeros((_SLAB_ROWS, LANES), jnp.float32)

    def put(s, name, arr, row_off=0):
        r0, _, _ = _LAYOUT[name]
        arr = jnp.asarray(arr, jnp.float32)
        return s.at[r0 + row_off:r0 + row_off + arr.shape[0], :arr.shape[1]].set(arr)

    slab = put(slab, "a1_w1_com", a1w1[INP:, :])
    slab = put(slab, "a2_w1_com", a2w1[INP:, :])
    slab = put(slab, "a1_w2_out", a1w2[:, :OUT])
    slab = put(slab, "a1_w2_com", a1w2[:, OUT:])
    slab = put(slab, "a2_w2", a2w2)
    slab = put(slab, "biases", a1b2[:, :OUT], row_off=0)
    slab = put(slab, "biases", a1b2[:, OUT:], row_off=1)
    slab = put(slab, "biases", a2b2, row_off=2)

    in_w = jnp.stack([a1w1[:INP, :], a2w1[:INP, :]], axis=0).astype(jnp.float32)
    in_b = jnp.concatenate([a1b1, a2b1], axis=0).astype(jnp.float32)
    return slab, in_w, in_b


def _leaky(x):
    # leaky_relu(negative_slope=0.01) == max(x, 0.01*x): mul+max, no select.
    return jnp.maximum(x, 0.01 * x)


def _softmax35(v):
    z = 35.0 * v
    # Keep max-subtraction: exp(35*v) can overflow without it.
    z = z - jnp.max(z, axis=-1, keepdims=True)
    e = jnp.exp(z)
    return e * pl.reciprocal(jnp.sum(e, axis=-1, keepdims=True), approx=True)


def _dot(a, b):
    return jnp.dot(a, b, preferred_element_type=jnp.float32)


def game_kernel(hc_ref, w_ref, out1_ref, out2_ref):
    T = out1_ref.shape[0]

    def piece(name):
        r0, nr, nc = _LAYOUT[name]
        return w_ref[pl.ds(r0, nr), pl.ds(0, nc)]

    # Hoisted weight loads (live across the whole unrolled loop; ~20 vregs at
    # LAYER=25 — fine.  If T/LAYER grows and the bundle dump shows spills,
    # re-load these from VMEM per phase instead of hoisting.)
    w1c_1 = piece("a1_w1_com")            # (COM, LAYER)  com2 -> agent1 hidden
    w1c_2 = piece("a2_w1_com")            # (COM, LAYER)  com1 -> agent2 hidden
    w2o_1 = piece("a1_w2_out")            # (LAYER, OUT)
    w2c_1 = piece("a1_w2_com")            # (LAYER, COM)
    w2_2 = piece("a2_w2")                 # (LAYER, OUT+COM), fused
    br0, _, _ = _LAYOUT["biases"]
    b2o_1 = w_ref[pl.ds(br0, 1), pl.ds(0, OUT)]            # (1, OUT)
    b2c_1 = w_ref[pl.ds(br0 + 1, 1), pl.ds(0, COM)]        # (1, COM)
    b2_2 = w_ref[pl.ds(br0 + 2, 1), pl.ds(0, OUT + COM)]   # (1, OUT+COM)

    h1c = hc_ref[pl.ds(0, 1), :]          # (1, LAYER)  I1[0] @ W1_in + b1 (agent 1)
    h2c = hc_ref[pl.ds(1, 1), :]          # (1, LAYER)  I2[0] @ W1_in + b1 (agent 2)

    # Running com sums in post-W1 projected space:
    #   r2 = sum_i dot(com2_i, w1c_1),  r1 = sum_i dot(com1_i, w1c_2)
    # so the mean-pooled hidden pre-activation is h_const + r * 1/(t+1).
    r1 = jnp.zeros((1, LAYER), jnp.float32)
    r2 = jnp.zeros((1, LAYER), jnp.float32)

    # Fully unrolled: 1/(t+1) folds to compile-time constants and the output
    # row stores use static indices.  (For very large T use lax.fori_loop.)
    for t in range(T):
        inv = 1.0 / float(t + 1)

        # -- phase 1: agent 1 speaks; mean of com2[:t+1] (row t still zero).
        h1 = _leaky(h1c + inv * r2)
        c1 = _softmax35(_leaky(_dot(h1, w2c_1) + b2c_1))           # com1[t]
        r1 = r1 + _dot(c1, w1c_2)                                   # project once

        # -- phase 2: agent 2 responds; mean of com1[:t+1] (row t now filled).
        h2 = _leaky(h2c + inv * r1)
        f2 = _leaky(_dot(h2, w2_2) + b2_2)                          # (1, OUT+COM)
        out2_ref[pl.ds(t, 1), :] = f2[:, :OUT]
        c2 = _softmax35(f2[:, OUT:])                                # com2[t]
        r2 = r2 + _dot(c2, w1c_1)                                   # project once

        # -- phase 3: agent 1 output; updated mean of com2[:t+1].
        h1b = _leaky(h1c + inv * r2)
        out1_ref[pl.ds(t, 1), :] = _leaky(_dot(h1b, w2o_1) + b2o_1)


def iterative_game_pool(I1, I2, packed):
    """I1, I2: (T, INP); packed = pack_weights(params)."""
    w_slab, in_w, in_b = packed
    T = I1.shape[0]

    # Hoisted input-dependent first-layer constants (tiny dots, XLA side).
    i1 = I1[0].astype(jnp.float32)
    i2 = I2[0].astype(jnp.float32)
    h1c = i1 @ in_w[0] + in_b[0]
    h2c = i2 @ in_w[1] + in_b[1]
    h_const = jnp.stack([h1c, h2c], axis=0)          # (2, LAYER)

    def full(shape):
        return pl.BlockSpec(shape, lambda i: (0, 0))

    grid_spec = pltpu.PrefetchScalarGridSpec(
        num_scalar_prefetch=0,
        grid=(1,),
        in_specs=[full((2, LAYER)), full((_SLAB_ROWS, LANES))],
        out_specs=[full((T, OUT)), full((T, OUT))],
    )

    out1, out2 = pl.pallas_call(
        game_kernel,
        out_shape=(jax.ShapeDtypeStruct((T, OUT), jnp.float32),
                   jax.ShapeDtypeStruct((T, OUT), jnp.float32)),
        grid_spec=grid_spec,
        compiler_params=pltpu.CompilerParams(
            dimension_semantics=("arbitrary",)),     # serial recurrence
    )(h_const, w_slab)
    return out1, out2


def make_params(key):
    """Deterministic init mimicking torch.nn.Linear: U(-1/sqrt(fan_in), 1/sqrt(fan_in)).
    Weights returned transposed to (in, out); biases as (1, out)."""
    def linear(key, fan_in, fan_out):
        kw, kb = jax.random.split(key)
        lim = 1.0 / jnp.sqrt(fan_in)
        w = jax.random.uniform(kw, (fan_in, fan_out), jnp.float32, -lim, lim)
        b = jax.random.uniform(kb, (1, fan_out), jnp.float32, -lim, lim)
        return w, b

    k1, k2, k3, k4 = jax.random.split(key, 4)
    a1w1, a1b1 = linear(k1, INP + COM, LAYER)
    a1w2, a1b2 = linear(k2, LAYER, OUT + COM)
    a2w1, a2b1 = linear(k3, INP + COM, LAYER)
    a2w2, a2b2 = linear(k4, LAYER, OUT + COM)
    return (a1w1, a1b1, a1w2, a1b2, a2w1, a2b1, a2w2, a2b2)


def ref_forward(I1, I2, params):
    """Pure-JAX reference mirroring the PyTorch loop exactly."""
    a1w1, a1b1, a1w2, a1b2, a2w1, a2b1, a2w2, a2b2 = params
    T = I1.shape[0]
    i1 = I1[0].astype(jnp.float32)
    i2 = I2[0].astype(jnp.float32)
    com1 = jnp.zeros((T, COM), jnp.float32)
    com2 = jnp.zeros((T, COM), jnp.float32)
    out1 = jnp.zeros((T, OUT), jnp.float32)
    out2 = jnp.zeros((T, OUT), jnp.float32)

    def leaky(x):
        return jnp.where(x >= 0, x, 0.01 * x)

    def mlp(x, w1, b1, w2, b2):
        return leaky(leaky(x @ w1 + b1[0]) @ w2 + b2[0])

    def sm35(v):
        z = 35.0 * v
        z = z - z.max()
        e = jnp.exp(z)
        return e / e.sum()

    for t in range(T):
        avg_c2 = com2[:t + 1].mean(axis=0)
        f1 = mlp(jnp.concatenate([i1, avg_c2]), a1w1, a1b1, a1w2, a1b2)
        com1 = com1.at[t].set(sm35(f1[OUT:]))
        avg_c1 = com1[:t + 1].mean(axis=0)
        f2 = mlp(jnp.concatenate([i2, avg_c1]), a2w1, a2b1, a2w2, a2b2)
        out2 = out2.at[t].set(f2[:OUT])
        com2 = com2.at[t].set(sm35(f2[OUT:]))
        avg_c2b = com2[:t + 1].mean(axis=0)
        f1b = mlp(jnp.concatenate([i1, avg_c2b]), a1w1, a1b1, a1w2, a1b2)
        out1 = out1.at[t].set(f1b[:OUT])
    return out1, out2


if __name__ == "__main__":
    key = jax.random.PRNGKey(0)
    kp, k1, k2 = jax.random.split(key, 3)

    T = 8  # sequence / iteration length (I1.shape[0] in the PyTorch module)
    I1 = jax.random.normal(k1, (T, INP), jnp.float32)
    I2 = jax.random.normal(k2, (T, INP), jnp.float32)
    params = make_params(kp)
    packed = pack_weights(params)   # packed once, outside the hot path

    out1, out2 = iterative_game_pool(I1, I2, packed)
    out1 = jax.block_until_ready(out1)
    out2 = jax.block_until_ready(out2)

    r1, r2 = ref_forward(I1, I2, params)
    assert jnp.allclose(out1, r1, rtol=2e-3, atol=1e-3), "out1 mismatch vs reference"
    assert jnp.allclose(out2, r2, rtol=2e-3, atol=1e-3), "out2 mismatch vs reference"

    print("KERNEL_OK")
</pallas_src>

<mosaic_0001>
module attributes {stable_mosaic.version = 11 : i64} {
  func.func @game_kernel(%arg0: i32, %arg1: memref<2x25xf32, #tpu.memory_space<vmem>>, %arg2: memref<120x128xf32, #tpu.memory_space<vmem>>, %arg3: memref<8x5xf32, #tpu.memory_space<vmem>>, %arg4: memref<8x5xf32, #tpu.memory_space<vmem>>) attributes {dimension_semantics = [#tpu.dimension_semantics<arbitrary>], iteration_bounds = array<i64: 1>, scalar_prefetch = 0 : i64, scratch_operands = 0 : i64, tpu.core_type = #tpu.core_type<tc>, window_params = [{pipeline_mode = #tpu.pipeline_mode<synchronous>, transform_indices = @transform_0, window_bounds = array<i64: 2, 25>}, {pipeline_mode = #tpu.pipeline_mode<synchronous>, transform_indices = @transform_1, window_bounds = array<i64: 120, 128>}, {pipeline_mode = #tpu.pipeline_mode<synchronous>, transform_indices = @transform_2, window_bounds = array<i64: 8, 5>}, {pipeline_mode = #tpu.pipeline_mode<synchronous>, transform_indices = @transform_3, window_bounds = array<i64: 8, 5>}]} {
    %c0 = arith.constant 0 : index
    %c0_0 = arith.constant 0 : index
    %0 = vector.load %arg2[%c0, %c0_0] : memref<120x128xf32, #tpu.memory_space<vmem>>, vector<5x25xf32>
    %c8 = arith.constant 8 : index
    %c0_1 = arith.constant 0 : index
    %1 = vector.load %arg2[%c8, %c0_1] : memref<120x128xf32, #tpu.memory_space<vmem>>, vector<5x25xf32>
    %c16 = arith.constant 16 : index
    %c0_2 = arith.constant 0 : index
    %2 = vector.load %arg2[%c16, %c0_2] : memref<120x128xf32, #tpu.memory_space<vmem>>, vector<25x5xf32>
    %c48 = arith.constant 48 : index
    %c0_3 = arith.constant 0 : index
    %3 = vector.load %arg2[%c48, %c0_3] : memref<120x128xf32, #tpu.memory_space<vmem>>, vector<25x5xf32>
    %c80 = arith.constant 80 : index
    %c0_4 = arith.constant 0 : index
    %4 = vector.load %arg2[%c80, %c0_4] : memref<120x128xf32, #tpu.memory_space<vmem>>, vector<25x10xf32>
    %c112 = arith.constant 112 : index
    %c0_5 = arith.constant 0 : index
    %5 = vector.load %arg2[%c112, %c0_5] : memref<120x128xf32, #tpu.memory_space<vmem>>, vector<1x5xf32>
    %c113 = arith.constant 113 : index
    %c0_6 = arith.constant 0 : index
    %6 = vector.load %arg2[%c113, %c0_6] : memref<120x128xf32, #tpu.memory_space<vmem>>, vector<1x5xf32>
    %c114 = arith.constant 114 : index
    %c0_7 = arith.constant 0 : index
    %7 = vector.load %arg2[%c114, %c0_7] : memref<120x128xf32, #tpu.memory_space<vmem>>, vector<1x10xf32>
    %c0_8 = arith.constant 0 : index
    %c0_9 = arith.constant 0 : index
    %8 = vector.load %arg1[%c0_8, %c0_9] : memref<2x25xf32, #tpu.memory_space<vmem>>, vector<1x25xf32>
    %c1 = arith.constant 1 : index
    %c0_10 = arith.constant 0 : index
    %9 = vector.load %arg1[%c1, %c0_10] : memref<2x25xf32, #tpu.memory_space<vmem>>, vector<1x25xf32>
    %cst = arith.constant 0.000000e+00 : f32
    %10 = vector.broadcast %cst : f32 to vector<1x25xf32>
    %cst_11 = arith.constant 0.000000e+00 : f32
    %11 = vector.broadcast %cst_11 : f32 to vector<1x25xf32>
    %cst_12 = arith.constant 1.000000e+00 : f32
    %12 = vector.broadcast %cst_12 : f32 to vector<1x25xf32>
    %13 = arith.mulf %12, %11 : vector<1x25xf32>
    %14 = arith.addf %8, %13 : vector<1x25xf32>
    %cst_13 = arith.constant 0.00999999977 : f32
    %15 = vector.broadcast %cst_13 : f32 to vector<1x25xf32>
    %16 = arith.mulf %15, %14 : vector<1x25xf32>
    %17 = arith.maximumf %14, %16 : vector<1x25xf32>
    %cst_14 = arith.constant dense<0.000000e+00> : vector<1x5xf32>
    %18 = tpu.matmul %17, %3, %cst_14 {dimension_numbers = #tpu.dot_dimension_numbers<[1], [0], [0], [1], [0, 0, 1, 1], [], []>} : vector<1x25xf32>, vector<25x5xf32>, vector<1x5xf32> -> vector<1x5xf32>
    %19 = arith.addf %18, %6 : vector<1x5xf32>
    %cst_15 = arith.constant 0.00999999977 : f32
    %20 = vector.broadcast %cst_15 : f32 to vector<1x5xf32>
    %21 = arith.mulf %20, %19 : vector<1x5xf32>
    %22 = arith.maximumf %19, %21 : vector<1x5xf32>
    %cst_16 = arith.constant 3.500000e+01 : f32
    %23 = vector.broadcast %cst_16 : f32 to vector<1x5xf32>
    %24 = arith.mulf %23, %22 : vector<1x5xf32>
    %cst_17 = arith.constant dense<0xFF800000> : vector<1xf32>
    %25 = vector.multi_reduction <maximumf>, %24, %cst_17 [1] : vector<1x5xf32> to vector<1xf32>
    %26 = vector.shape_cast %25 : vector<1xf32> to vector<1x1xf32>
    %27 = vector.broadcast %26 : vector<1x1xf32> to vector<1x5xf32>
    %28 = arith.subf %24, %27 : vector<1x5xf32>
    %29 = math.exp %28 : vector<1x5xf32>
    %cst_18 = arith.constant dense<0.000000e+00> : vector<1xf32>
    %30 = vector.multi_reduction <add>, %29, %cst_18 [1] : vector<1x5xf32> to vector<1xf32>
    %31 = vector.shape_cast %30 : vector<1xf32> to vector<1x1xf32>
    %32 = tpu.reciprocal %31 {approx = true} : vector<1x1xf32> -> vector<1x1xf32>
    %33 = vector.broadcast %32 : vector<1x1xf32> to vector<1x5xf32>
    %34 = arith.mulf %29, %33 : vector<1x5xf32>
    %cst_19 = arith.constant dense<0.000000e+00> : vector<1x25xf32>
    %35 = tpu.matmul %34, %1, %cst_19 {dimension_numbers = #tpu.dot_dimension_numbers<[1], [0], [0], [1], [0, 0, 1, 1], [], []>} : vector<1x5xf32>, vector<5x25xf32>, vector<1x25xf32> -> vector<1x25xf32>
    %36 = arith.addf %10, %35 : vector<1x25xf32>
    %cst_20 = arith.constant 1.000000e+00 : f32
    %37 = vector.broadcast %cst_20 : f32 to vector<1x25xf32>
    %38 = arith.mulf %37, %36 : vector<1x25xf32>
    %39 = arith.addf %9, %38 : vector<1x25xf32>
    %cst_21 = arith.constant 0.00999999977 : f32
    %40 = vector.broadcast %cst_21 : f32 to vector<1x25xf32>
    %41 = arith.mulf %40, %39 : vector<1x25xf32>
    %42 = arith.maximumf %39, %41 : vector<1x25xf32>
    %cst_22 = arith.constant dense<0.000000e+00> : vector<1x10xf32>
    %43 = tpu.matmul %42, %4, %cst_22 {dimension_numbers = #tpu.dot_dimension_numbers<[1], [0], [0], [1], [0, 0, 1, 1], [], []>} : vector<1x25xf32>, vector<25x10xf32>, vector<1x10xf32> -> vector<1x10xf32>
    %44 = arith.addf %43, %7 : vector<1x10xf32>
    %cst_23 = arith.constant 0.00999999977 : f32
    %45 = vector.broadcast %cst_23 : f32 to vector<1x10xf32>
    %46 = arith.mulf %45, %44 : vector<1x10xf32>
    %47 = arith.maximumf %44, %46 : vector<1x10xf32>
    %48 = vector.extract_strided_slice %47 {offsets = [0, 0], sizes = [1, 5], strides = [1, 1]} : vector<1x10xf32> to vector<1x5xf32>
    %c0_24 = arith.constant 0 : index
    %c0_25 = arith.constant 0 : index
    %49 = vector.load %arg4[%c0_24, %c0_25] : memref<8x5xf32, #tpu.memory_space<vmem>>, vector<1x5xf32>
    tpu.vector_store %arg4[%c0_24, %c0_25], %48 {strides = array<i32>} : memref<8x5xf32, #tpu.memory_space<vmem>>, vector<1x5xf32>,
    %50 = vector.extract_strided_slice %47 {offsets = [0, 5], sizes = [1, 5], strides = [1, 1]} : vector<1x10xf32> to vector<1x5xf32>
    %cst_26 = arith.constant 3.500000e+01 : f32
    %51 = vector.broadcast %cst_26 : f32 to vector<1x5xf32>
    %52 = arith.mulf %51, %50 : vector<1x5xf32>
    %cst_27 = arith.constant dense<0xFF800000> : vector<1xf32>
    %53 = vector.multi_reduction <maximumf>, %52, %cst_27 [1] : vector<1x5xf32> to vector<1xf32>
    %54 = vector.shape_cast %53 : vector<1xf32> to vector<1x1xf32>
    %55 = vector.broadcast %54 : vector<1x1xf32> to vector<1x5xf32>
    %56 = arith.subf %52, %55 : vector<1x5xf32>
    %57 = math.exp %56 : vector<1x5xf32>
    %cst_28 = arith.constant dense<0.000000e+00> : vector<1xf32>
    %58 = vector.multi_reduction <add>, %57, %cst_28 [1] : vector<1x5xf32> to vector<1xf32>
    %59 = vector.shape_cast %58 : vector<1xf32> to vector<1x1xf32>
    %60 = tpu.reciprocal %59 {approx = true} : vector<1x1xf32> -> vector<1x1xf32>
    %61 = vector.broadcast %60 : vector<1x1xf32> to vector<1x5xf32>
    %62 = arith.mulf %57, %61 : vector<1x5xf32>
    %cst_29 = arith.constant dense<0.000000e+00> : vector<1x25xf32>
    %63 = tpu.matmul %62, %0, %cst_29 {dimension_numbers = #tpu.dot_dimension_numbers<[1], [0], [0], [1], [0, 0, 1, 1], [], []>} : vector<1x5xf32>, vector<5x25xf32>, vector<1x25xf32> -> vector<1x25xf32>
    %64 = arith.addf %11, %63 : vector<1x25xf32>
    %cst_30 = arith.constant 1.000000e+00 : f32
    %65 = vector.broadcast %cst_30 : f32 to vector<1x25xf32>
    %66 = arith.mulf %65, %64 : vector<1x25xf32>
    %67 = arith.addf %8, %66 : vector<1x25xf32>
    %cst_31 = arith.constant 0.00999999977 : f32
    %68 = vector.broadcast %cst_31 : f32 to vector<1x25xf32>
    %69 = arith.mulf %68, %67 : vector<1x25xf32>
    %70 = arith.maximumf %67, %69 : vector<1x25xf32>
    %cst_32 = arith.constant dense<0.000000e+00> : vector<1x5xf32>
    %71 = tpu.matmul %70, %2, %cst_32 {dimension_numbers = #tpu.dot_dimension_numbers<[1], [0], [0], [1], [0, 0, 1, 1], [], []>} : vector<1x25xf32>, vector<25x5xf32>, vector<1x5xf32> -> vector<1x5xf32>
    %72 = arith.addf %71, %5 : vector<1x5xf32>
    %cst_33 = arith.constant 0.00999999977 : f32
    %73 = vector.broadcast %cst_33 : f32 to vector<1x5xf32>
    %74 = arith.mulf %73, %72 : vector<1x5xf32>
    %75 = arith.maximumf %72, %74 : vector<1x5xf32>
    %c0_34 = arith.constant 0 : index
    %c0_35 = arith.constant 0 : index
    %76 = vector.load %arg3[%c0_34, %c0_35] : memref<8x5xf32, #tpu.memory_space<vmem>>, vector<1x5xf32>
    tpu.vector_store %arg3[%c0_34, %c0_35], %75 {strides = array<i32>} : memref<8x5xf32, #tpu.memory_space<vmem>>, vector<1x5xf32>,
    %cst_36 = arith.constant 5.000000e-01 : f32
    %77 = vector.broadcast %cst_36 : f32 to vector<1x25xf32>
    %78 = arith.mulf %77, %64 : vector<1x25xf32>
    %79 = arith.addf %8, %78 : vector<1x25xf32>
    %cst_37 = arith.constant 0.00999999977 : f32
    %80 = vector.broadcast %cst_37 : f32 to vector<1x25xf32>
    %81 = arith.mulf %80, %79 : vector<1x25xf32>
    %82 = arith.maximumf %79, %81 : vector<1x25xf32>
    %cst_38 = arith.constant dense<0.000000e+00> : vector<1x5xf32>
    %83 = tpu.matmul %82, %3, %cst_38 {dimension_numbers = #tpu.dot_dimension_numbers<[1], [0], [0], [1], [0, 0, 1, 1], [], []>} : vector<1x25xf32>, vector<25x5xf32>, vector<1x5xf32> -> vector<1x5xf32>
    %84 = arith.addf %83, %6 : vector<1x5xf32>
    %cst_39 = arith.constant 0.00999999977 : f32
    %85 = vector.broadcast %cst_39 : f32 to vector<1x5xf32>
    %86 = arith.mulf %85, %84 : vector<1x5xf32>
    %87 = arith.maximumf %84, %86 : vector<1x5xf32>
    %cst_40 = arith.constant 3.500000e+01 : f32
    %88 = vector.broadcast %cst_40 : f32 to vector<1x5xf32>
    %89 = arith.mulf %88, %87 : vector<1x5xf32>
    %cst_41 = arith.constant dense<0xFF800000> : vector<1xf32>
    %90 = vector.multi_reduction <maximumf>, %89, %cst_41 [1] : vector<1x5xf32> to vector<1xf32>
    %91 = vector.shape_cast %90 : vector<1xf32> to vector<1x1xf32>
    %92 = vector.broadcast %91 : vector<1x1xf32> to vector<1x5xf32>
    %93 = arith.subf %89, %92 : vector<1x5xf32>
    %94 = math.exp %93 : vector<1x5xf32>
    %cst_42 = arith.constant dense<0.000000e+00> : vector<1xf32>
    %95 = vector.multi_reduction <add>, %94, %cst_42 [1] : vector<1x5xf32> to vector<1xf32>
    %96 = vector.shape_cast %95 : vector<1xf32> to vector<1x1xf32>
    %97 = tpu.reciprocal %96 {approx = true} : vector<1x1xf32> -> vector<1x1xf32>
    %98 = vector.broadcast %97 : vector<1x1xf32> to vector<1x5xf32>
    %99 = arith.mulf %94, %98 : vector<1x5xf32>
    %cst_43 = arith.constant dense<0.000000e+00> : vector<1x25xf32>
    %100 = tpu.matmul %99, %1, %cst_43 {dimension_numbers = #tpu.dot_dimension_numbers<[1], [0], [0], [1], [0, 0, 1, 1], [], []>} : vector<1x5xf32>, vector<5x25xf32>, vector<1x25xf32> -> vector<1x25xf32>
    %101 = arith.addf %36, %100 : vector<1x25xf32>
    %cst_44 = arith.constant 5.000000e-01 : f32
    %102 = vector.broadcast %cst_44 : f32 to vector<1x25xf32>
    %103 = arith.mulf %102, %101 : vector<1x25xf32>
    %104 = arith.addf %9, %103 : vector<1x25xf32>
    %cst_45 = arith.constant 0.00999999977 : f32
    %105 = vector.broadcast %cst_45 : f32 to vector<1x25xf32>
    %106 = arith.mulf %105, %104 : vector<1x25xf32>
    %107 = arith.maximumf %104, %106 : vector<1x25xf32>
    %cst_46 = arith.constant dense<0.000000e+00> : vector<1x10xf32>
    %108 = tpu.matmul %107, %4, %cst_46 {dimension_numbers = #tpu.dot_dimension_numbers<[1], [0], [0], [1], [0, 0, 1, 1], [], []>} : vector<1x25xf32>, vector<25x10xf32>, vector<1x10xf32> -> vector<1x10xf32>
    %109 = arith.addf %108, %7 : vector<1x10xf32>
    %cst_47 = arith.constant 0.00999999977 : f32
    %110 = vector.broadcast %cst_47 : f32 to vector<1x10xf32>
    %111 = arith.mulf %110, %109 : vector<1x10xf32>
    %112 = arith.maximumf %109, %111 : vector<1x10xf32>
    %113 = vector.extract_strided_slice %112 {offsets = [0, 0], sizes = [1, 5], strides = [1, 1]} : vector<1x10xf32> to vector<1x5xf32>
    %c1_48 = arith.constant 1 : index
    %c0_49 = arith.constant 0 : index
    %114 = vector.load %arg4[%c1_48, %c0_49] : memref<8x5xf32, #tpu.memory_space<vmem>>, vector<1x5xf32>
    tpu.vector_store %arg4[%c1_48, %c0_49], %113 {strides = array<i32>} : memref<8x5xf32, #tpu.memory_space<vmem>>, vector<1x5xf32>,
    %115 = vector.extract_strided_slice %112 {offsets = [0, 5], sizes = [1, 5], strides = [1, 1]} : vector<1x10xf32> to vector<1x5xf32>
    %cst_50 = arith.constant 3.500000e+01 : f32
    %116 = vector.broadcast %cst_50 : f32 to vector<1x5xf32>
    %117 = arith.mulf %116, %115 : vector<1x5xf32>
    %cst_51 = arith.constant dense<0xFF800000> : vector<1xf32>
    %118 = vector.multi_reduction <maximumf>, %117, %cst_51 [1] : vector<1x5xf32> to vector<1xf32>
    %119 = vector.shape_cast %118 : vector<1xf32> to vector<1x1xf32>
    %120 = vector.broadcast %119 : vector<1x1xf32> to vector<1x5xf32>
    %121 = arith.subf %117, %120 : vector<1x5xf32>
    %122 = math.exp %121 : vector<1x5xf32>
    %cst_52 = arith.constant dense<0.000000e+00> : vector<1xf32>
    %123 = vector.multi_reduction <add>, %122, %cst_52 [1] : vector<1x5xf32> to vector<1xf32>
    %124 = vector.shape_cast %123 : vector<1xf32> to vector<1x1xf32>
    %125 = tpu.reciprocal %124 {approx = true} : vector<1x1xf32> -> vector<1x1xf32>
    %126 = vector.broadcast %125 : vector<1x1xf32> to vector<1x5xf32>
    %127 = arith.mulf %122, %126 : vector<1x5xf32>
    %cst_53 = arith.constant dense<0.000000e+00> : vector<1x25xf32>
    %128 = tpu.matmul %127, %0, %cst_53 {dimension_numbers = #tpu.dot_dimension_numbers<[1], [0], [0], [1], [0, 0, 1, 1], [], []>} : vector<1x5xf32>, vector<5x25xf32>, vector<1x25xf32> -> vector<1x25xf32>
    %129 = arith.addf %64, %128 : vector<1x25xf32>
    %cst_54 = arith.constant 5.000000e-01 : f32
    %130 = vector.broadcast %cst_54 : f32 to vector<1x25xf32>
    %131 = arith.mulf %130, %129 : vector<1x25xf32>
    %132 = arith.addf %8, %131 : vector<1x25xf32>
    %cst_55 = arith.constant 0.00999999977 : f32
    %133 = vector.broadcast %cst_55 : f32 to vector<1x25xf32>
    %134 = arith.mulf %133, %132 : vector<1x25xf32>
    %135 = arith.maximumf %132, %134 : vector<1x25xf32>
    %cst_56 = arith.constant dense<0.000000e+00> : vector<1x5xf32>
    %136 = tpu.matmul %135, %2, %cst_56 {dimension_numbers = #tpu.dot_dimension_numbers<[1], [0], [0], [1], [0, 0, 1, 1], [], []>} : vector<1x25xf32>, vector<25x5xf32>, vector<1x5xf32> -> vector<1x5xf32>
    %137 = arith.addf %136, %5 : vector<1x5xf32>
    %cst_57 = arith.constant 0.00999999977 : f32
    %138 = vector.broadcast %cst_57 : f32 to vector<1x5xf32>
    %139 = arith.mulf %138, %137 : vector<1x5xf32>
    %140 = arith.maximumf %137, %139 : vector<1x5xf32>
    %c1_58 = arith.constant 1 : index
    %c0_59 = arith.constant 0 : index
    %141 = vector.load %arg3[%c1_58, %c0_59] : memref<8x5xf32, #tpu.memory_space<vmem>>, vector<1x5xf32>
    tpu.vector_store %arg3[%c1_58, %c0_59], %140 {strides = array<i32>} : memref<8x5xf32, #tpu.memory_space<vmem>>, vector<1x5xf32>,
    %cst_60 = arith.constant 0.333333343 : f32
    %142 = vector.broadcast %cst_60 : f32 to vector<1x25xf32>
    %143 = arith.mulf %142, %129 : vector<1x25xf32>
    %144 = arith.addf %8, %143 : vector<1x25xf32>
    %cst_61 = arith.constant 0.00999999977 : f32
    %145 = vector.broadcast %cst_61 : f32 to vector<1x25xf32>
    %146 = arith.mulf %145, %144 : vector<1x25xf32>
    %147 = arith.maximumf %144, %146 : vector<1x25xf32>
    %cst_62 = arith.constant dense<0.000000e+00> : vector<1x5xf32>
    %148 = tpu.matmul %147, %3, %cst_62 {dimension_numbers = #tpu.dot_dimension_numbers<[1], [0], [0], [1], [0, 0, 1, 1], [], []>} : vector<1x25xf32>, vector<25x5xf32>, vector<1x5xf32> -> vector<1x5xf32>
    %149 = arith.addf %148, %6 : vector<1x5xf32>
    %cst_63 = arith.constant 0.00999999977 : f32
    %150 = vector.broadcast %cst_63 : f32 to vector<1x5xf32>
    %151 = arith.mulf %150, %149 : vector<1x5xf32>
    %152 = arith.maximumf %149, %151 : vector<1x5xf32>
    %cst_64 = arith.constant 3.500000e+01 : f32
    %153 = vector.broadcast %cst_64 : f32 to vector<1x5xf32>
    %154 = arith.mulf %153, %152 : vector<1x5xf32>
    %cst_65 = arith.constant dense<0xFF800000> : vector<1xf32>
    %155 = vector.multi_reduction <maximumf>, %154, %cst_65 [1] : vector<1x5xf32> to vector<1xf32>
    %156 = vector.shape_cast %155 : vector<1xf32> to vector<1x1xf32>
    %157 = vector.broadcast %156 : vector<1x1xf32> to vector<1x5xf32>
    %158 = arith.subf %154, %157 : vector<1x5xf32>
    %159 = math.exp %158 : vector<1x5xf32>
    %cst_66 = arith.constant dense<0.000000e+00> : vector<1xf32>
    %160 = vector.multi_reduction <add>, %159, %cst_66 [1] : vector<1x5xf32> to vector<1xf32>
    %161 = vector.shape_cast %160 : vector<1xf32> to vector<1x1xf32>
    %162 = tpu.reciprocal %161 {approx = true} : vector<1x1xf32> -> vector<1x1xf32>
    %163 = vector.broadcast %162 : vector<1x1xf32> to vector<1x5xf32>
    %164 = arith.mulf %159, %163 : vector<1x5xf32>
    %cst_67 = arith.constant dense<0.000000e+00> : vector<1x25xf32>
    %165 = tpu.matmul %164, %1, %cst_67 {dimension_numbers = #tpu.dot_dimension_numbers<[1], [0], [0], [1], [0, 0, 1, 1], [], []>} : vector<1x5xf32>, vector<5x25xf32>, vector<1x25xf32> -> vector<1x25xf32>
    %166 = arith.addf %101, %165 : vector<1x25xf32>
    %cst_68 = arith.constant 0.333333343 : f32
    %167 = vector.broadcast %cst_68 : f32 to vector<1x25xf32>
    %168 = arith.mulf %167, %166 : vector<1x25xf32>
    %169 = arith.addf %9, %168 : vector<1x25xf32>
    %cst_69 = arith.constant 0.00999999977 : f32
    %170 = vector.broadcast %cst_69 : f32 to vector<1x25xf32>
    %171 = arith.mulf %170, %169 : vector<1x25xf32>
    %172 = arith.maximumf %169, %171 : vector<1x25xf32>
    %cst_70 = arith.constant dense<0.000000e+00> : vector<1x10xf32>
    %173 = tpu.matmul %172, %4, %cst_70 {dimension_numbers = #tpu.dot_dimension_numbers<[1], [0], [0], [1], [0, 0, 1, 1], [], []>} : vector<1x25xf32>, vector<25x10xf32>, vector<1x10xf32> -> vector<1x10xf32>
    %174 = arith.addf %173, %7 : vector<1x10xf32>
    %cst_71 = arith.constant 0.00999999977 : f32
    %175 = vector.broadcast %cst_71 : f32 to vector<1x10xf32>
    %176 = arith.mulf %175, %174 : vector<1x10xf32>
    %177 = arith.maximumf %174, %176 : vector<1x10xf32>
    %178 = vector.extract_strided_slice %177 {offsets = [0, 0], sizes = [1, 5], strides = [1, 1]} : vector<1x10xf32> to vector<1x5xf32>
    %c2 = arith.constant 2 : index
    %c0_72 = arith.constant 0 : index
    %179 = vector.load %arg4[%c2, %c0_72] : memref<8x5xf32, #tpu.memory_space<vmem>>, vector<1x5xf32>
    tpu.vector_store %arg4[%c2, %c0_72], %178 {strides = array<i32>} : memref<8x5xf32, #tpu.memory_space<vmem>>, vector<1x5xf32>,
    %180 = vector.extract_strided_slice %177 {offsets = [0, 5], sizes = [1, 5], strides = [1, 1]} : vector<1x10xf32> to vector<1x5xf32>
    %cst_73 = arith.constant 3.500000e+01 : f32
    %181 = vector.broadcast %cst_73 : f32 to vector<1x5xf32>
    %182 = arith.mulf %181, %180 : vector<1x5xf32>
    %cst_74 = arith.constant dense<0xFF800000> : vector<1xf32>
    %183 = vector.multi_reduction <maximumf>, %182, %cst_74 [1] : vector<1x5xf32> to vector<1xf32>
    %184 = vector.shape_cast %183 : vector<1xf32> to vector<1x1xf32>
    %185 = vector.broadcast %184 : vector<1x1xf32> to vector<1x5xf32>
    %186 = arith.subf %182, %185 : vector<1x5xf32>
    %187 = math.exp %186 : vector<1x5xf32>
    %cst_75 = arith.constant dense<0.000000e+00> : vector<1xf32>
    %188 = vector.multi_reduction <add>, %187, %cst_75 [1] : vector<1x5xf32> to vector<1xf32>
    %189 = vector.shape_cast %188 : vector<1xf32> to vector<1x1xf32>
    %190 = tpu.reciprocal %189 {approx = true} : vector<1x1xf32> -> vector<1x1xf32>
    %191 = vector.broadcast %190 : vector<1x1xf32> to vector<1x5xf32>
    %192 = arith.mulf %187, %191 : vector<1x5xf32>
    %cst_76 = arith.constant dense<0.000000e+00> : vector<1x25xf32>
    %193 = tpu.matmul %192, %0, %cst_76 {dimension_numbers = #tpu.dot_dimension_numbers<[1], [0], [0], [1], [0, 0, 1, 1], [], []>} : vector<1x5xf32>, vector<5x25xf32>, vector<1x25xf32> -> vector<1x25xf32>
    %194 = arith.addf %129, %193 : vector<1x25xf32>
    %cst_77 = arith.constant 0.333333343 : f32
    %195 = vector.broadcast %cst_77 : f32 to vector<1x25xf32>
    %196 = arith.mulf %195, %194 : vector<1x25xf32>
    %197 = arith.addf %8, %196 : vector<1x25xf32>
    %cst_78 = arith.constant 0.00999999977 : f32
    %198 = vector.broadcast %cst_78 : f32 to vector<1x25xf32>
    %199 = arith.mulf %198, %197 : vector<1x25xf32>
    %200 = arith.maximumf %197, %199 : vector<1x25xf32>
    %cst_79 = arith.constant dense<0.000000e+00> : vector<1x5xf32>
    %201 = tpu.matmul %200, %2, %cst_79 {dimension_numbers = #tpu.dot_dimension_numbers<[1], [0], [0], [1], [0, 0, 1, 1], [], []>} : vector<1x25xf32>, vector<25x5xf32>, vector<1x5xf32> -> vector<1x5xf32>
    %202 = arith.addf %201, %5 : vector<1x5xf32>
    %cst_80 = arith.constant 0.00999999977 : f32
    %203 = vector.broadcast %cst_80 : f32 to vector<1x5xf32>
    %204 = arith.mulf %203, %202 : vector<1x5xf32>
    %205 = arith.maximumf %202, %204 : vector<1x5xf32>
    %c2_81 = arith.constant 2 : index
    %c0_82 = arith.constant 0 : index
    %206 = vector.load %arg3[%c2_81, %c0_82] : memref<8x5xf32, #tpu.memory_space<vmem>>, vector<1x5xf32>
    tpu.vector_store %arg3[%c2_81, %c0_82], %205 {strides = array<i32>} : memref<8x5xf32, #tpu.memory_space<vmem>>, vector<1x5xf32>,
    %cst_83 = arith.constant 2.500000e-01 : f32
    %207 = vector.broadcast %cst_83 : f32 to vector<1x25xf32>
    %208 = arith.mulf %207, %194 : vector<1x25xf32>
    %209 = arith.addf %8, %208 : vector<1x25xf32>
    %cst_84 = arith.constant 0.00999999977 : f32
    %210 = vector.broadcast %cst_84 : f32 to vector<1x25xf32>
    %211 = arith.mulf %210, %209 : vector<1x25xf32>
    %212 = arith.maximumf %209, %211 : vector<1x25xf32>
    %cst_85 = arith.constant dense<0.000000e+00> : vector<1x5xf32>
    %213 = tpu.matmul %212, %3, %cst_85 {dimension_numbers = #tpu.dot_dimension_numbers<[1], [0], [0], [1], [0, 0, 1, 1], [], []>} : vector<1x25xf32>, vector<25x5xf32>, vector<1x5xf32> -> vector<1x5xf32>
    %214 = arith.addf %213, %6 : vector<1x5xf32>
    %cst_86 = arith.constant 0.00999999977 : f32
    %215 = vector.broadcast %cst_86 : f32 to vector<1x5xf32>
    %216 = arith.mulf %215, %214 : vector<1x5xf32>
    %217 = arith.maximumf %214, %216 : vector<1x5xf32>
    %cst_87 = arith.constant 3.500000e+01 : f32
    %218 = vector.broadcast %cst_87 : f32 to vector<1x5xf32>
    %219 = arith.mulf %218, %217 : vector<1x5xf32>
    %cst_88 = arith.constant dense<0xFF800000> : vector<1xf32>
    %220 = vector.multi_reduction <maximumf>, %219, %cst_88 [1] : vector<1x5xf32> to vector<1xf32>
    %221 = vector.shape_cast %220 : vector<1xf32> to vector<1x1xf32>
    %222 = vector.broadcast %221 : vector<1x1xf32> to vector<1x5xf32>
    %223 = arith.subf %219, %222 : vector<1x5xf32>
    %224 = math.exp %223 : vector<1x5xf32>
    %cst_89 = arith.constant dense<0.000000e+00> : vector<1xf32>
    %225 = vector.multi_reduction <add>, %224, %cst_89 [1] : vector<1x5xf32> to vector<1xf32>
    %226 = vector.shape_cast %225 : vector<1xf32> to vector<1x1xf32>
    %227 = tpu.reciprocal %226 {approx = true} : vector<1x1xf32> -> vector<1x1xf32>
    %228 = vector.broadcast %227 : vector<1x1xf32> to vector<1x5xf32>
    %229 = arith.mulf %224, %228 : vector<1x5xf32>
    %cst_90 = arith.constant dense<0.000000e+00> : vector<1x25xf32>
    %230 = tpu.matmul %229, %1, %cst_90 {dimension_numbers = #tpu.dot_dimension_numbers<[1], [0], [0], [1], [0, 0, 1, 1], [], []>} : vector<1x5xf32>, vector<5x25xf32>, vector<1x25xf32> -> vector<1x25xf32>
    %231 = arith.addf %166, %230 : vector<1x25xf32>
    %cst_91 = arith.constant 2.500000e-01 : f32
    %232 = vector.broadcast %cst_91 : f32 to vector<1x25xf32>
    %233 = arith.mulf %232, %231 : vector<1x25xf32>
    %234 = arith.addf %9, %233 : vector<1x25xf32>
    %cst_92 = arith.constant 0.00999999977 : f32
    %235 = vector.broadcast %cst_92 : f32 to vector<1x25xf32>
    %236 = arith.mulf %235, %234 : vector<1x25xf32>
    %237 = arith.maximumf %234, %236 : vector<1x25xf32>
    %cst_93 = arith.constant dense<0.000000e+00> : vector<1x10xf32>
    %238 = tpu.matmul %237, %4, %cst_93 {dimension_numbers = #tpu.dot_dimension_numbers<[1], [0], [0], [1], [0, 0, 1, 1], [], []>} : vector<1x25xf32>, vector<25x10xf32>, vector<1x10xf32> -> vector<1x10xf32>
    %239 = arith.addf %238, %7 : vector<1x10xf32>
    %cst_94 = arith.constant 0.00999999977 : f32
    %240 = vector.broadcast %cst_94 : f32 to vector<1x10xf32>
    %241 = arith.mulf %240, %239 : vector<1x10xf32>
    %242 = arith.maximumf %239, %241 : vector<1x10xf32>
    %243 = vector.extract_strided_slice %242 {offsets = [0, 0], sizes = [1, 5], strides = [1, 1]} : vector<1x10xf32> to vector<1x5xf32>
    %c3 = arith.constant 3 : index
    %c0_95 = arith.constant 0 : index
    %244 = vector.load %arg4[%c3, %c0_95] : memref<8x5xf32, #tpu.memory_space<vmem>>, vector<1x5xf32>
    tpu.vector_store %arg4[%c3, %c0_95], %243 {strides = array<i32>} : memref<8x5xf32, #tpu.memory_space<vmem>>, vector<1x5xf32>,
    %245 = vector.extract_strided_slice %242 {offsets = [0, 5], sizes = [1, 5], strides = [1, 1]} : vector<1x10xf32> to vector<1x5xf32>
    %cst_96 = arith.constant 3.500000e+01 : f32
    %246 = vector.broadcast %cst_96 : f32 to vector<1x5xf32>
    %247 = arith.mulf %246, %245 : vector<1x5xf32>
    %cst_97 = arith.constant dense<0xFF800000> : vector<1xf32>
    %248 = vector.multi_reduction <maximumf>, %247, %cst_97 [1] : vector<1x5xf32> to vector<1xf32>
    %249 = vector.shape_cast %248 : vector<1xf32> to vector<1x1xf32>
    %250 = vector.broadcast %249 : vector<1x1xf32> to vector<1x5xf32>
    %251 = arith.subf %247, %250 : vector<1x5xf32>
    %252 = math.exp %251 : vector<1x5xf32>
    %cst_98 = arith.constant dense<0.000000e+00> : vector<1xf32>
    %253 = vector.multi_reduction <add>, %252, %cst_98 [1] : vector<1x5xf32> to vector<1xf32>
    %254 = vector.shape_cast %253 : vector<1xf32> to vector<1x1xf32>
    %255 = tpu.reciprocal %254 {approx = true} : vector<1x1xf32> -> vector<1x1xf32>
    %256 = vector.broadcast %255 : vector<1x1xf32> to vector<1x5xf32>
    %257 = arith.mulf %252, %256 : vector<1x5xf32>
    %cst_99 = arith.constant dense<0.000000e+00> : vector<1x25xf32>
    %258 = tpu.matmul %257, %0, %cst_99 {dimension_numbers = #tpu.dot_dimension_numbers<[1], [0], [0], [1], [0, 0, 1, 1], [], []>} : vector<1x5xf32>, vector<5x25xf32>, vector<1x25xf32> -> vector<1x25xf32>
    %259 = arith.addf %194, %258 : vector<1x25xf32>
    %cst_100 = arith.constant 2.500000e-01 : f32
    %260 = vector.broadcast %cst_100 : f32 to vector<1x25xf32>
    %261 = arith.mulf %260, %259 : vector<1x25xf32>
    %262 = arith.addf %8, %261 : vector<1x25xf32>
    %cst_101 = arith.constant 0.00999999977 : f32
    %263 = vector.broadcast %cst_101 : f32 to vector<1x25xf32>
    %264 = arith.mulf %263, %262 : vector<1x25xf32>
    %265 = arith.maximumf %262, %264 : vector<1x25xf32>
    %cst_102 = arith.constant dense<0.000000e+00> : vector<1x5xf32>
    %266 = tpu.matmul %265, %2, %cst_102 {dimension_numbers = #tpu.dot_dimension_numbers<[1], [0], [0], [1], [0, 0, 1, 1], [], []>} : vector<1x25xf32>, vector<25x5xf32>, vector<1x5xf32> -> vector<1x5xf32>
    %267 = arith.addf %266, %5 : vector<1x5xf32>
    %cst_103 = arith.constant 0.00999999977 : f32
    %268 = vector.broadcast %cst_103 : f32 to vector<1x5xf32>
    %269 = arith.mulf %268, %267 : vector<1x5xf32>
    %270 = arith.maximumf %267, %269 : vector<1x5xf32>
    %c3_104 = arith.constant 3 : index
    %c0_105 = arith.constant 0 : index
    %271 = vector.load %arg3[%c3_104, %c0_105] : memref<8x5xf32, #tpu.memory_space<vmem>>, vector<1x5xf32>
    tpu.vector_store %arg3[%c3_104, %c0_105], %270 {strides = array<i32>} : memref<8x5xf32, #tpu.memory_space<vmem>>, vector<1x5xf32>,
    %cst_106 = arith.constant 2.000000e-01 : f32
    %272 = vector.broadcast %cst_106 : f32 to vector<1x25xf32>
    %273 = arith.mulf %272, %259 : vector<1x25xf32>
    %274 = arith.addf %8, %273 : vector<1x25xf32>
    %cst_107 = arith.constant 0.00999999977 : f32
    %275 = vector.broadcast %cst_107 : f32 to vector<1x25xf32>
    %276 = arith.mulf %275, %274 : vector<1x25xf32>
    %277 = arith.maximumf %274, %276 : vector<1x25xf32>
    %cst_108 = arith.constant dense<0.000000e+00> : vector<1x5xf32>
    %278 = tpu.matmul %277, %3, %cst_108 {dimension_numbers = #tpu.dot_dimension_numbers<[1], [0], [0], [1], [0, 0, 1, 1], [], []>} : vector<1x25xf32>, vector<25x5xf32>, vector<1x5xf32> -> vector<1x5xf32>
    %279 = arith.addf %278, %6 : vector<1x5xf32>
    %cst_109 = arith.constant 0.00999999977 : f32
    %280 = vector.broadcast %cst_109 : f32 to vector<1x5xf32>
    %281 = arith.mulf %280, %279 : vector<1x5xf32>
    %282 = arith.maximumf %279, %281 : vector<1x5xf32>
    %cst_110 = arith.constant 3.500000e+01 : f32
    %283 = vector.broadcast %cst_110 : f32 to vector<1x5xf32>
    %284 = arith.mulf %283, %282 : vector<1x5xf32>
    %cst_111 = arith.constant dense<0xFF800000> : vector<1xf32>
    %285 = vector.multi_reduction <maximumf>, %284, %cst_111 [1] : vector<1x5xf32> to vector<1xf32>
    %286 = vector.shape_cast %285 : vector<1xf32> to vector<1x1xf32>
    %287 = vector.broadcast %286 : vector<1x1xf32> to vector<1x5xf32>
    %288 = arith.subf %284, %287 : vector<1x5xf32>
    %289 = math.exp %288 : vector<1x5xf32>
    %cst_112 = arith.constant dense<0.000000e+00> : vector<1xf32>
    %290 = vector.multi_reduction <add>, %289, %cst_112 [1] : vector<1x5xf32> to vector<1xf32>
    %291 = vector.shape_cast %290 : vector<1xf32> to vector<1x1xf32>
    %292 = tpu.reciprocal %291 {approx = true} : vector<1x1xf32> -> vector<1x1xf32>
    %293 = vector.broadcast %292 : vector<1x1xf32> to vector<1x5xf32>
    %294 = arith.mulf %289, %293 : vector<1x5xf32>
    %cst_113 = arith.constant dense<0.000000e+00> : vector<1x25xf32>
    %295 = tpu.matmul %294, %1, %cst_113 {dimension_numbers = #tpu.dot_dimension_numbers<[1], [0], [0], [1], [0, 0, 1, 1], [], []>} : vector<1x5xf32>, vector<5x25xf32>, vector<1x25xf32> -> vector<1x25xf32>
    %296 = arith.addf %231, %295 : vector<1x25xf32>
    %cst_114 = arith.constant 2.000000e-01 : f32
    %297 = vector.broadcast %cst_114 : f32 to vector<1x25xf32>
    %298 = arith.mulf %297, %296 : vector<1x25xf32>
    %299 = arith.addf %9, %298 : vector<1x25xf32>
    %cst_115 = arith.constant 0.00999999977 : f32
    %300 = vector.broadcast %cst_115 : f32 to vector<1x25xf32>
    %301 = arith.mulf %300, %299 : vector<1x25xf32>
    %302 = arith.maximumf %299, %301 : vector<1x25xf32>
    %cst_116 = arith.constant dense<0.000000e+00> : vector<1x10xf32>
    %303 = tpu.matmul %302, %4, %cst_116 {dimension_numbers = #tpu.dot_dimension_numbers<[1], [0], [0], [1], [0, 0, 1, 1], [], []>} : vector<1x25xf32>, vector<25x10xf32>, vector<1x10xf32> -> vector<1x10xf32>
    %304 = arith.addf %303, %7 : vector<1x10xf32>
    %cst_117 = arith.constant 0.00999999977 : f32
    %305 = vector.broadcast %cst_117 : f32 to vector<1x10xf32>
    %306 = arith.mulf %305, %304 : vector<1x10xf32>
    %307 = arith.maximumf %304, %306 : vector<1x10xf32>
    %308 = vector.extract_strided_slice %307 {offsets = [0, 0], sizes = [1, 5], strides = [1, 1]} : vector<1x10xf32> to vector<1x5xf32>
    %c4 = arith.constant 4 : index
    %c0_118 = arith.constant 0 : index
    %309 = vector.load %arg4[%c4, %c0_118] : memref<8x5xf32, #tpu.memory_space<vmem>>, vector<1x5xf32>
    tpu.vector_store %arg4[%c4, %c0_118], %308 {strides = array<i32>} : memref<8x5xf32, #tpu.memory_space<vmem>>, vector<1x5xf32>,
    %310 = vector.extract_strided_slice %307 {offsets = [0, 5], sizes = [1, 5], strides = [1, 1]} : vector<1x10xf32> to vector<1x5xf32>
    %cst_119 = arith.constant 3.500000e+01 : f32
    %311 = vector.broadcast %cst_119 : f32 to vector<1x5xf32>
    %312 = arith.mulf %311, %310 : vector<1x5xf32>
    %cst_120 = arith.constant dense<0xFF800000> : vector<1xf32>
    %313 = vector.multi_reduction <maximumf>, %312, %cst_120 [1] : vector<1x5xf32> to vector<1xf32>
    %314 = vector.shape_cast %313 : vector<1xf32> to vector<1x1xf32>
    %315 = vector.broadcast %314 : vector<1x1xf32> to vector<1x5xf32>
    %316 = arith.subf %312, %315 : vector<1x5xf32>
    %317 = math.exp %316 : vector<1x5xf32>
    %cst_121 = arith.constant dense<0.000000e+00> : vector<1xf32>
    %318 = vector.multi_reduction <add>, %317, %cst_121 [1] : vector<1x5xf32> to vector<1xf32>
    %319 = vector.shape_cast %318 : vector<1xf32> to vector<1x1xf32>
    %320 = tpu.reciprocal %319 {approx = true} : vector<1x1xf32> -> vector<1x1xf32>
    %321 = vector.broadcast %320 : vector<1x1xf32> to vector<1x5xf32>
    %322 = arith.mulf %317, %321 : vector<1x5xf32>
    %cst_122 = arith.constant dense<0.000000e+00> : vector<1x25xf32>
    %323 = tpu.matmul %322, %0, %cst_122 {dimension_numbers = #tpu.dot_dimension_numbers<[1], [0], [0], [1], [0, 0, 1, 1], [], []>} : vector<1x5xf32>, vector<5x25xf32>, vector<1x25xf32> -> vector<1x25xf32>
    %324 = arith.addf %259, %323 : vector<1x25xf32>
    %cst_123 = arith.constant 2.000000e-01 : f32
    %325 = vector.broadcast %cst_123 : f32 to vector<1x25xf32>
    %326 = arith.mulf %325, %324 : vector<1x25xf32>
    %327 = arith.addf %8, %326 : vector<1x25xf32>
    %cst_124 = arith.constant 0.00999999977 : f32
    %328 = vector.broadcast %cst_124 : f32 to vector<1x25xf32>
    %329 = arith.mulf %328, %327 : vector<1x25xf32>
    %330 = arith.maximumf %327, %329 : vector<1x25xf32>
    %cst_125 = arith.constant dense<0.000000e+00> : vector<1x5xf32>
    %331 = tpu.matmul %330, %2, %cst_125 {dimension_numbers = #tpu.dot_dimension_numbers<[1], [0], [0], [1], [0, 0, 1, 1], [], []>} : vector<1x25xf32>, vector<25x5xf32>, vector<1x5xf32> -> vector<1x5xf32>
    %332 = arith.addf %331, %5 : vector<1x5xf32>
    %cst_126 = arith.constant 0.00999999977 : f32
    %333 = vector.broadcast %cst_126 : f32 to vector<1x5xf32>
    %334 = arith.mulf %333, %332 : vector<1x5xf32>
    %335 = arith.maximumf %332, %334 : vector<1x5xf32>
    %c4_127 = arith.constant 4 : index
    %c0_128 = arith.constant 0 : index
    %336 = vector.load %arg3[%c4_127, %c0_128] : memref<8x5xf32, #tpu.memory_space<vmem>>, vector<1x5xf32>
    tpu.vector_store %arg3[%c4_127, %c0_128], %335 {strides = array<i32>} : memref<8x5xf32, #tpu.memory_space<vmem>>, vector<1x5xf32>,
    %cst_129 = arith.constant 0.166666672 : f32
    %337 = vector.broadcast %cst_129 : f32 to vector<1x25xf32>
    %338 = arith.mulf %337, %324 : vector<1x25xf32>
    %339 = arith.addf %8, %338 : vector<1x25xf32>
    %cst_130 = arith.constant 0.00999999977 : f32
    %340 = vector.broadcast %cst_130 : f32 to vector<1x25xf32>
    %341 = arith.mulf %340, %339 : vector<1x25xf32>
    %342 = arith.maximumf %339, %341 : vector<1x25xf32>
    %cst_131 = arith.constant dense<0.000000e+00> : vector<1x5xf32>
    %343 = tpu.matmul %342, %3, %cst_131 {dimension_numbers = #tpu.dot_dimension_numbers<[1], [0], [0], [1], [0, 0, 1, 1], [], []>} : vector<1x25xf32>, vector<25x5xf32>, vector<1x5xf32> -> vector<1x5xf32>
    %344 = arith.addf %343, %6 : vector<1x5xf32>
    %cst_132 = arith.constant 0.00999999977 : f32
    %345 = vector.broadcast %cst_132 : f32 to vector<1x5xf32>
    %346 = arith.mulf %345, %344 : vector<1x5xf32>
    %347 = arith.maximumf %344, %346 : vector<1x5xf32>
    %cst_133 = arith.constant 3.500000e+01 : f32
    %348 = vector.broadcast %cst_133 : f32 to vector<1x5xf32>
    %349 = arith.mulf %348, %347 : vector<1x5xf32>
    %cst_134 = arith.constant dense<0xFF800000> : vector<1xf32>
    %350 = vector.multi_reduction <maximumf>, %349, %cst_134 [1] : vector<1x5xf32> to vector<1xf32>
    %351 = vector.shape_cast %350 : vector<1xf32> to vector<1x1xf32>
    %352 = vector.broadcast %351 : vector<1x1xf32> to vector<1x5xf32>
    %353 = arith.subf %349, %352 : vector<1x5xf32>
    %354 = math.exp %353 : vector<1x5xf32>
    %cst_135 = arith.constant dense<0.000000e+00> : vector<1xf32>
    %355 = vector.multi_reduction <add>, %354, %cst_135 [1] : vector<1x5xf32> to vector<1xf32>
    %356 = vector.shape_cast %355 : vector<1xf32> to vector<1x1xf32>
    %357 = tpu.reciprocal %356 {approx = true} : vector<1x1xf32> -> vector<1x1xf32>
    %358 = vector.broadcast %357 : vector<1x1xf32> to vector<1x5xf32>
    %359 = arith.mulf %354, %358 : vector<1x5xf32>
    %cst_136 = arith.constant dense<0.000000e+00> : vector<1x25xf32>
    %360 = tpu.matmul %359, %1, %cst_136 {dimension_numbers = #tpu.dot_dimension_numbers<[1], [0], [0], [1], [0, 0, 1, 1], [], []>} : vector<1x5xf32>, vector<5x25xf32>, vector<1x25xf32> -> vector<1x25xf32>
    %361 = arith.addf %296, %360 : vector<1x25xf32>
    %cst_137 = arith.constant 0.166666672 : f32
    %362 = vector.broadcast %cst_137 : f32 to vector<1x25xf32>
    %363 = arith.mulf %362, %361 : vector<1x25xf32>
    %364 = arith.addf %9, %363 : vector<1x25xf32>
    %cst_138 = arith.constant 0.00999999977 : f32
    %365 = vector.broadcast %cst_138 : f32 to vector<1x25xf32>
    %366 = arith.mulf %365, %364 : vector<1x25xf32>
    %367 = arith.maximumf %364, %366 : vector<1x25xf32>
    %cst_139 = arith.constant dense<0.000000e+00> : vector<1x10xf32>
    %368 = tpu.matmul %367, %4, %cst_139 {dimension_numbers = #tpu.dot_dimension_numbers<[1], [0], [0], [1], [0, 0, 1, 1], [], []>} : vector<1x25xf32>, vector<25x10xf32>, vector<1x10xf32> -> vector<1x10xf32>
    %369 = arith.addf %368, %7 : vector<1x10xf32>
    %cst_140 = arith.constant 0.00999999977 : f32
    %370 = vector.broadcast %cst_140 : f32 to vector<1x10xf32>
    %371 = arith.mulf %370, %369 : vector<1x10xf32>
    %372 = arith.maximumf %369, %371 : vector<1x10xf32>
    %373 = vector.extract_strided_slice %372 {offsets = [0, 0], sizes = [1, 5], strides = [1, 1]} : vector<1x10xf32> to vector<1x5xf32>
    %c5 = arith.constant 5 : index
    %c0_141 = arith.constant 0 : index
    %374 = vector.load %arg4[%c5, %c0_141] : memref<8x5xf32, #tpu.memory_space<vmem>>, vector<1x5xf32>
    tpu.vector_store %arg4[%c5, %c0_141], %373 {strides = array<i32>} : memref<8x5xf32, #tpu.memory_space<vmem>>, vector<1x5xf32>,
    %375 = vector.extract_strided_slice %372 {offsets = [0, 5], sizes = [1, 5], strides = [1, 1]} : vector<1x10xf32> to vector<1x5xf32>
    %cst_142 = arith.constant 3.500000e+01 : f32
    %376 = vector.broadcast %cst_142 : f32 to vector<1x5xf32>
    %377 = arith.mulf %376, %375 : vector<1x5xf32>
    %cst_143 = arith.constant dense<0xFF800000> : vector<1xf32>
    %378 = vector.multi_reduction <maximumf>, %377, %cst_143 [1] : vector<1x5xf32> to vector<1xf32>
    %379 = vector.shape_cast %378 : vector<1xf32> to vector<1x1xf32>
    %380 = vector.broadcast %379 : vector<1x1xf32> to vector<1x5xf32>
    %381 = arith.subf %377, %380 : vector<1x5xf32>
    %382 = math.exp %381 : vector<1x5xf32>
    %cst_144 = arith.constant dense<0.000000e+00> : vector<1xf32>
    %383 = vector.multi_reduction <add>, %382, %cst_144 [1] : vector<1x5xf32> to vector<1xf32>
    %384 = vector.shape_cast %383 : vector<1xf32> to vector<1x1xf32>
    %385 = tpu.reciprocal %384 {approx = true} : vector<1x1xf32> -> vector<1x1xf32>
    %386 = vector.broadcast %385 : vector<1x1xf32> to vector<1x5xf32>
    %387 = arith.mulf %382, %386 : vector<1x5xf32>
    %cst_145 = arith.constant dense<0.000000e+00> : vector<1x25xf32>
    %388 = tpu.matmul %387, %0, %cst_145 {dimension_numbers = #tpu.dot_dimension_numbers<[1], [0], [0], [1], [0, 0, 1, 1], [], []>} : vector<1x5xf32>, vector<5x25xf32>, vector<1x25xf32> -> vector<1x25xf32>
    %389 = arith.addf %324, %388 : vector<1x25xf32>
    %cst_146 = arith.constant 0.166666672 : f32
    %390 = vector.broadcast %cst_146 : f32 to vector<1x25xf32>
    %391 = arith.mulf %390, %389 : vector<1x25xf32>
    %392 = arith.addf %8, %391 : vector<1x25xf32>
    %cst_147 = arith.constant 0.00999999977 : f32
    %393 = vector.broadcast %cst_147 : f32 to vector<1x25xf32>
    %394 = arith.mulf %393, %392 : vector<1x25xf32>
    %395 = arith.maximumf %392, %394 : vector<1x25xf32>
    %cst_148 = arith.constant dense<0.000000e+00> : vector<1x5xf32>
    %396 = tpu.matmul %395, %2, %cst_148 {dimension_numbers = #tpu.dot_dimension_numbers<[1], [0], [0], [1], [0, 0, 1, 1], [], []>} : vector<1x25xf32>, vector<25x5xf32>, vector<1x5xf32> -> vector<1x5xf32>
    %397 = arith.addf %396, %5 : vector<1x5xf32>
    %cst_149 = arith.constant 0.00999999977 : f32
    %398 = vector.broadcast %cst_149 : f32 to vector<1x5xf32>
    %399 = arith.mulf %398, %397 : vector<1x5xf32>
    %400 = arith.maximumf %397, %399 : vector<1x5xf32>
    %c5_150 = arith.constant 5 : index
    %c0_151 = arith.constant 0 : index
    %401 = vector.load %arg3[%c5_150, %c0_151] : memref<8x5xf32, #tpu.memory_space<vmem>>, vector<1x5xf32>
    tpu.vector_store %arg3[%c5_150, %c0_151], %400 {strides = array<i32>} : memref<8x5xf32, #tpu.memory_space<vmem>>, vector<1x5xf32>,
    %cst_152 = arith.constant 0.142857149 : f32
    %402 = vector.broadcast %cst_152 : f32 to vector<1x25xf32>
    %403 = arith.mulf %402, %389 : vector<1x25xf32>
    %404 = arith.addf %8, %403 : vector<1x25xf32>
    %cst_153 = arith.constant 0.00999999977 : f32
    %405 = vector.broadcast %cst_153 : f32 to vector<1x25xf32>
    %406 = arith.mulf %405, %404 : vector<1x25xf32>
    %407 = arith.maximumf %404, %406 : vector<1x25xf32>
    %cst_154 = arith.constant dense<0.000000e+00> : vector<1x5xf32>
    %408 = tpu.matmul %407, %3, %cst_154 {dimension_numbers = #tpu.dot_dimension_numbers<[1], [0], [0], [1], [0, 0, 1, 1], [], []>} : vector<1x25xf32>, vector<25x5xf32>, vector<1x5xf32> -> vector<1x5xf32>
    %409 = arith.addf %408, %6 : vector<1x5xf32>
    %cst_155 = arith.constant 0.00999999977 : f32
    %410 = vector.broadcast %cst_155 : f32 to vector<1x5xf32>
    %411 = arith.mulf %410, %409 : vector<1x5xf32>
    %412 = arith.maximumf %409, %411 : vector<1x5xf32>
    %cst_156 = arith.constant 3.500000e+01 : f32
    %413 = vector.broadcast %cst_156 : f32 to vector<1x5xf32>
    %414 = arith.mulf %413, %412 : vector<1x5xf32>
    %cst_157 = arith.constant dense<0xFF800000> : vector<1xf32>
    %415 = vector.multi_reduction <maximumf>, %414, %cst_157 [1] : vector<1x5xf32> to vector<1xf32>
    %416 = vector.shape_cast %415 : vector<1xf32> to vector<1x1xf32>
    %417 = vector.broadcast %416 : vector<1x1xf32> to vector<1x5xf32>
    %418 = arith.subf %414, %417 : vector<1x5xf32>
    %419 = math.exp %418 : vector<1x5xf32>
    %cst_158 = arith.constant dense<0.000000e+00> : vector<1xf32>
    %420 = vector.multi_reduction <add>, %419, %cst_158 [1] : vector<1x5xf32> to vector<1xf32>
    %421 = vector.shape_cast %420 : vector<1xf32> to vector<1x1xf32>
    %422 = tpu.reciprocal %421 {approx = true} : vector<1x1xf32> -> vector<1x1xf32>
    %423 = vector.broadcast %422 : vector<1x1xf32> to vector<1x5xf32>
    %424 = arith.mulf %419, %423 : vector<1x5xf32>
    %cst_159 = arith.constant dense<0.000000e+00> : vector<1x25xf32>
    %425 = tpu.matmul %424, %1, %cst_159 {dimension_numbers = #tpu.dot_dimension_numbers<[1], [0], [0], [1], [0, 0, 1, 1], [], []>} : vector<1x5xf32>, vector<5x25xf32>, vector<1x25xf32> -> vector<1x25xf32>
    %426 = arith.addf %361, %425 : vector<1x25xf32>
    %cst_160 = arith.constant 0.142857149 : f32
    %427 = vector.broadcast %cst_160 : f32 to vector<1x25xf32>
    %428 = arith.mulf %427, %426 : vector<1x25xf32>
    %429 = arith.addf %9, %428 : vector<1x25xf32>
    %cst_161 = arith.constant 0.00999999977 : f32
    %430 = vector.broadcast %cst_161 : f32 to vector<1x25xf32>
    %431 = arith.mulf %430, %429 : vector<1x25xf32>
    %432 = arith.maximumf %429, %431 : vector<1x25xf32>
    %cst_162 = arith.constant dense<0.000000e+00> : vector<1x10xf32>
    %433 = tpu.matmul %432, %4, %cst_162 {dimension_numbers = #tpu.dot_dimension_numbers<[1], [0], [0], [1], [0, 0, 1, 1], [], []>} : vector<1x25xf32>, vector<25x10xf32>, vector<1x10xf32> -> vector<1x10xf32>
    %434 = arith.addf %433, %7 : vector<1x10xf32>
    %cst_163 = arith.constant 0.00999999977 : f32
    %435 = vector.broadcast %cst_163 : f32 to vector<1x10xf32>
    %436 = arith.mulf %435, %434 : vector<1x10xf32>
    %437 = arith.maximumf %434, %436 : vector<1x10xf32>
    %438 = vector.extract_strided_slice %437 {offsets = [0, 0], sizes = [1, 5], strides = [1, 1]} : vector<1x10xf32> to vector<1x5xf32>
    %c6 = arith.constant 6 : index
    %c0_164 = arith.constant 0 : index
    %439 = vector.load %arg4[%c6, %c0_164] : memref<8x5xf32, #tpu.memory_space<vmem>>, vector<1x5xf32>
    tpu.vector_store %arg4[%c6, %c0_164], %438 {strides = array<i32>} : memref<8x5xf32, #tpu.memory_space<vmem>>, vector<1x5xf32>,
    %440 = vector.extract_strided_slice %437 {offsets = [0, 5], sizes = [1, 5], strides = [1, 1]} : vector<1x10xf32> to vector<1x5xf32>
    %cst_165 = arith.constant 3.500000e+01 : f32
    %441 = vector.broadcast %cst_165 : f32 to vector<1x5xf32>
    %442 = arith.mulf %441, %440 : vector<1x5xf32>
    %cst_166 = arith.constant dense<0xFF800000> : vector<1xf32>
    %443 = vector.multi_reduction <maximumf>, %442, %cst_166 [1] : vector<1x5xf32> to vector<1xf32>
    %444 = vector.shape_cast %443 : vector<1xf32> to vector<1x1xf32>
    %445 = vector.broadcast %444 : vector<1x1xf32> to vector<1x5xf32>
    %446 = arith.subf %442, %445 : vector<1x5xf32>
    %447 = math.exp %446 : vector<1x5xf32>
    %cst_167 = arith.constant dense<0.000000e+00> : vector<1xf32>
    %448 = vector.multi_reduction <add>, %447, %cst_167 [1] : vector<1x5xf32> to vector<1xf32>
    %449 = vector.shape_cast %448 : vector<1xf32> to vector<1x1xf32>
    %450 = tpu.reciprocal %449 {approx = true} : vector<1x1xf32> -> vector<1x1xf32>
    %451 = vector.broadcast %450 : vector<1x1xf32> to vector<1x5xf32>
    %452 = arith.mulf %447, %451 : vector<1x5xf32>
    %cst_168 = arith.constant dense<0.000000e+00> : vector<1x25xf32>
    %453 = tpu.matmul %452, %0, %cst_168 {dimension_numbers = #tpu.dot_dimension_numbers<[1], [0], [0], [1], [0, 0, 1, 1], [], []>} : vector<1x5xf32>, vector<5x25xf32>, vector<1x25xf32> -> vector<1x25xf32>
    %454 = arith.addf %389, %453 : vector<1x25xf32>
    %cst_169 = arith.constant 0.142857149 : f32
    %455 = vector.broadcast %cst_169 : f32 to vector<1x25xf32>
    %456 = arith.mulf %455, %454 : vector<1x25xf32>
    %457 = arith.addf %8, %456 : vector<1x25xf32>
    %cst_170 = arith.constant 0.00999999977 : f32
    %458 = vector.broadcast %cst_170 : f32 to vector<1x25xf32>
    %459 = arith.mulf %458, %457 : vector<1x25xf32>
    %460 = arith.maximumf %457, %459 : vector<1x25xf32>
    %cst_171 = arith.constant dense<0.000000e+00> : vector<1x5xf32>
    %461 = tpu.matmul %460, %2, %cst_171 {dimension_numbers = #tpu.dot_dimension_numbers<[1], [0], [0], [1], [0, 0, 1, 1], [], []>} : vector<1x25xf32>, vector<25x5xf32>, vector<1x5xf32> -> vector<1x5xf32>
    %462 = arith.addf %461, %5 : vector<1x5xf32>
    %cst_172 = arith.constant 0.00999999977 : f32
    %463 = vector.broadcast %cst_172 : f32 to vector<1x5xf32>
    %464 = arith.mulf %463, %462 : vector<1x5xf32>
    %465 = arith.maximumf %462, %464 : vector<1x5xf32>
    %c6_173 = arith.constant 6 : index
    %c0_174 = arith.constant 0 : index
    %466 = vector.load %arg3[%c6_173, %c0_174] : memref<8x5xf32, #tpu.memory_space<vmem>>, vector<1x5xf32>
    tpu.vector_store %arg3[%c6_173, %c0_174], %465 {strides = array<i32>} : memref<8x5xf32, #tpu.memory_space<vmem>>, vector<1x5xf32>,
    %cst_175 = arith.constant 1.250000e-01 : f32
    %467 = vector.broadcast %cst_175 : f32 to vector<1x25xf32>
    %468 = arith.mulf %467, %454 : vector<1x25xf32>
    %469 = arith.addf %8, %468 : vector<1x25xf32>
    %cst_176 = arith.constant 0.00999999977 : f32
    %470 = vector.broadcast %cst_176 : f32 to vector<1x25xf32>
    %471 = arith.mulf %470, %469 : vector<1x25xf32>
    %472 = arith.maximumf %469, %471 : vector<1x25xf32>
    %cst_177 = arith.constant dense<0.000000e+00> : vector<1x5xf32>
    %473 = tpu.matmul %472, %3, %cst_177 {dimension_numbers = #tpu.dot_dimension_numbers<[1], [0], [0], [1], [0, 0, 1, 1], [], []>} : vector<1x25xf32>, vector<25x5xf32>, vector<1x5xf32> -> vector<1x5xf32>
    %474 = arith.addf %473, %6 : vector<1x5xf32>
    %cst_178 = arith.constant 0.00999999977 : f32
    %475 = vector.broadcast %cst_178 : f32 to vector<1x5xf32>
    %476 = arith.mulf %475, %474 : vector<1x5xf32>
    %477 = arith.maximumf %474, %476 : vector<1x5xf32>
    %cst_179 = arith.constant 3.500000e+01 : f32
    %478 = vector.broadcast %cst_179 : f32 to vector<1x5xf32>
    %479 = arith.mulf %478, %477 : vector<1x5xf32>
    %cst_180 = arith.constant dense<0xFF800000> : vector<1xf32>
    %480 = vector.multi_reduction <maximumf>, %479, %cst_180 [1] : vector<1x5xf32> to vector<1xf32>
    %481 = vector.shape_cast %480 : vector<1xf32> to vector<1x1xf32>
    %482 = vector.broadcast %481 : vector<1x1xf32> to vector<1x5xf32>
    %483 = arith.subf %479, %482 : vector<1x5xf32>
    %484 = math.exp %483 : vector<1x5xf32>
    %cst_181 = arith.constant dense<0.000000e+00> : vector<1xf32>
    %485 = vector.multi_reduction <add>, %484, %cst_181 [1] : vector<1x5xf32> to vector<1xf32>
    %486 = vector.shape_cast %485 : vector<1xf32> to vector<1x1xf32>
    %487 = tpu.reciprocal %486 {approx = true} : vector<1x1xf32> -> vector<1x1xf32>
    %488 = vector.broadcast %487 : vector<1x1xf32> to vector<1x5xf32>
    %489 = arith.mulf %484, %488 : vector<1x5xf32>
    %cst_182 = arith.constant dense<0.000000e+00> : vector<1x25xf32>
    %490 = tpu.matmul %489, %1, %cst_182 {dimension_numbers = #tpu.dot_dimension_numbers<[1], [0], [0], [1], [0, 0, 1, 1], [], []>} : vector<1x5xf32>, vector<5x25xf32>, vector<1x25xf32> -> vector<1x25xf32>
    %491 = arith.addf %426, %490 : vector<1x25xf32>
    %cst_183 = arith.constant 1.250000e-01 : f32
    %492 = vector.broadcast %cst_183 : f32 to vector<1x25xf32>
    %493 = arith.mulf %492, %491 : vector<1x25xf32>
    %494 = arith.addf %9, %493 : vector<1x25xf32>
    %cst_184 = arith.constant 0.00999999977 : f32
    %495 = vector.broadcast %cst_184 : f32 to vector<1x25xf32>
    %496 = arith.mulf %495, %494 : vector<1x25xf32>
    %497 = arith.maximumf %494, %496 : vector<1x25xf32>
    %cst_185 = arith.constant dense<0.000000e+00> : vector<1x10xf32>
    %498 = tpu.matmul %497, %4, %cst_185 {dimension_numbers = #tpu.dot_dimension_numbers<[1], [0], [0], [1], [0, 0, 1, 1], [], []>} : vector<1x25xf32>, vector<25x10xf32>, vector<1x10xf32> -> vector<1x10xf32>
    %499 = arith.addf %498, %7 : vector<1x10xf32>
    %cst_186 = arith.constant 0.00999999977 : f32
    %500 = vector.broadcast %cst_186 : f32 to vector<1x10xf32>
    %501 = arith.mulf %500, %499 : vector<1x10xf32>
    %502 = arith.maximumf %499, %501 : vector<1x10xf32>
    %503 = vector.extract_strided_slice %502 {offsets = [0, 0], sizes = [1, 5], strides = [1, 1]} : vector<1x10xf32> to vector<1x5xf32>
    %c7 = arith.constant 7 : index
    %c0_187 = arith.constant 0 : index
    %504 = vector.load %arg4[%c7, %c0_187] : memref<8x5xf32, #tpu.memory_space<vmem>>, vector<1x5xf32>
    tpu.vector_store %arg4[%c7, %c0_187], %503 {strides = array<i32>} : memref<8x5xf32, #tpu.memory_space<vmem>>, vector<1x5xf32>,
    %505 = vector.extract_strided_slice %502 {offsets = [0, 5], sizes = [1, 5], strides = [1, 1]} : vector<1x10xf32> to vector<1x5xf32>
    %cst_188 = arith.constant 3.500000e+01 : f32
    %506 = vector.broadcast %cst_188 : f32 to vector<1x5xf32>
    %507 = arith.mulf %506, %505 : vector<1x5xf32>
    %cst_189 = arith.constant dense<0xFF800000> : vector<1xf32>
    %508 = vector.multi_reduction <maximumf>, %507, %cst_189 [1] : vector<1x5xf32> to vector<1xf32>
    %509 = vector.shape_cast %508 : vector<1xf32> to vector<1x1xf32>
    %510 = vector.broadcast %509 : vector<1x1xf32> to vector<1x5xf32>
    %511 = arith.subf %507, %510 : vector<1x5xf32>
    %512 = math.exp %511 : vector<1x5xf32>
    %cst_190 = arith.constant dense<0.000000e+00> : vector<1xf32>
    %513 = vector.multi_reduction <add>, %512, %cst_190 [1] : vector<1x5xf32> to vector<1xf32>
    %514 = vector.shape_cast %513 : vector<1xf32> to vector<1x1xf32>
    %515 = tpu.reciprocal %514 {approx = true} : vector<1x1xf32> -> vector<1x1xf32>
    %516 = vector.broadcast %515 : vector<1x1xf32> to vector<1x5xf32>
    %517 = arith.mulf %512, %516 : vector<1x5xf32>
    %cst_191 = arith.constant dense<0.000000e+00> : vector<1x25xf32>
    %518 = tpu.matmul %517, %0, %cst_191 {dimension_numbers = #tpu.dot_dimension_numbers<[1], [0], [0], [1], [0, 0, 1, 1], [], []>} : vector<1x5xf32>, vector<5x25xf32>, vector<1x25xf32> -> vector<1x25xf32>
    %519 = arith.addf %454, %518 : vector<1x25xf32>
    %cst_192 = arith.constant 1.250000e-01 : f32
    %520 = vector.broadcast %cst_192 : f32 to vector<1x25xf32>
    %521 = arith.mulf %520, %519 : vector<1x25xf32>
    %522 = arith.addf %8, %521 : vector<1x25xf32>
    %cst_193 = arith.constant 0.00999999977 : f32
    %523 = vector.broadcast %cst_193 : f32 to vector<1x25xf32>
    %524 = arith.mulf %523, %522 : vector<1x25xf32>
    %525 = arith.maximumf %522, %524 : vector<1x25xf32>
    %cst_194 = arith.constant dense<0.000000e+00> : vector<1x5xf32>
    %526 = tpu.matmul %525, %2, %cst_194 {dimension_numbers = #tpu.dot_dimension_numbers<[1], [0], [0], [1], [0, 0, 1, 1], [], []>} : vector<1x25xf32>, vector<25x5xf32>, vector<1x5xf32> -> vector<1x5xf32>
    %527 = arith.addf %526, %5 : vector<1x5xf32>
    %cst_195 = arith.constant 0.00999999977 : f32
    %528 = vector.broadcast %cst_195 : f32 to vector<1x5xf32>
    %529 = arith.mulf %528, %527 : vector<1x5xf32>
    %530 = arith.maximumf %527, %529 : vector<1x5xf32>
    %c7_196 = arith.constant 7 : index
    %c0_197 = arith.constant 0 : index
    %531 = vector.load %arg3[%c7_196, %c0_197] : memref<8x5xf32, #tpu.memory_space<vmem>>, vector<1x5xf32>
    tpu.vector_store %arg3[%c7_196, %c0_197], %530 {strides = array<i32>} : memref<8x5xf32, #tpu.memory_space<vmem>>, vector<1x5xf32>,
    return
  }
  func.func @transform_0(%arg0: i32) -> (i32, i32) {
    %c0_i32 = arith.constant 0 : i32
    %c0_i32_0 = arith.constant 0 : i32
    %c0_i32_1 = arith.constant 0 : i32
    return %c0_i32, %c0_i32_0 : i32, i32
  }
  func.func @transform_1(%arg0: i32) -> (i32, i32) {
    %c0_i32 = arith.constant 0 : i32
    %c0_i32_0 = arith.constant 0 : i32
    %c0_i32_1 = arith.constant 0 : i32
    return %c0_i32, %c0_i32_0 : i32, i32
  }
  func.func @transform_2(%arg0: i32) -> (i32, i32) {
    %c0_i32 = arith.constant 0 : i32
    %c0_i32_0 = arith.constant 0 : i32
    %c0_i32_1 = arith.constant 0 : i32
    return %c0_i32, %c0_i32_0 : i32, i32
  }
  func.func @transform_3(%arg0: i32) -> (i32, i32) {
    %c0_i32 = arith.constant 0 : i32
    %c0_i32_0 = arith.constant 0 : i32
    %c0_i32_1 = arith.constant 0 : i32
    return %c0_i32, %c0_i32_0 : i32, i32
  }
}

</mosaic_0001>

<bundles_post_ra>
// kernel: tpu_custom_call.1
= control target key start
LH: loop header
LB: loop body
LE: loop exit
PB: predicated region body
PF: predicated region fallthrough
CT: control target
= control target key end

     0   :  { %9 = vsyncpa [#allocation3], 0  ;;  %s4982_s0 = inlined_call_operand.hbm [shape: f32[2,25], index: 0, kind: input, shape index: {}]   ;;  %s4983_s1 = inlined_call_operand.hbm [shape: f32[120,128], index: 1, kind: input, shape index: {}]   ;;  %s4984_s2 = inlined_call_operand.hbm [shape: f32[8,5], index: 2, kind: output, shape index: {0}]   ;;  %s4985_s3 = inlined_call_operand.hbm [shape: f32[8,5], index: 3, kind: output, shape index: {1}]  }
   0x1   :  { %10 = vsyncpa [#allocation6], 0 }
   0x2   :  { %11 = vsyncpa [#allocation4], 0 }
   0x3   :  { %12 = vsyncpa [#allocation9], 0  ;;  %s4364_s12 = smov [#allocation2]   ;;  %s4365_s14 = smov [#allocation5]  }
   0x4   :  { %s19_s13 = sshll.u32 %s4364_s12, 4  ;;  %s28_s15 = sshll.u32 %s4365_s14, 4  ;;  %s20_s13 = int_to_ptr.vmem [resolvable:$true] %s19_s13  ;;  %s4395_s15 = int_to_ptr.vmem [resolvable:$true] %s28_s15 }
   0x5   :  { %s4268_s18 = scalar_lea.hbm %s4982_s0, 32 }
   0x6   :  { %p4269_p0 = scmp.ne.s32.totalorder %s4982_s0, %s4268_s18  ;;  %p4272_p1 = scmp.lt.u32.totalorder %s4268_s18, %s4982_s0 }
   0x8   :  { %p4274_p2 = pnand %p4272_p1, %p4269_p0 }
   0xa   :  { %4277 = shalt.err (!%p4274_p2)
}
   0xb   :  { %s4278_s23 = scalar_lea.vmem %s20_s13, 32  ;;  %p4283_p4 = scmp.lt.s32.totalorder %s20_s13, %s20_s13 }
   0xc   :  { %p4279_p3 = scmp.ne.s32.totalorder %s20_s13, %s4278_s23  ;;  %p4284_p5 = scmp.lt.s32.totalorder %s4278_s23, %s4278_s23 }
   0xe   :  { %p4285_p6 = por %p4284_p5, %p4283_p4 }
  0x10   :  { %p4286_p7 = pnand %p4285_p6, %p4279_p3 }
  0x12   :  { %4289 = shalt.err (!%p4286_p7)
}
  0x13   :  { %22 = dma.hbm_to_vmem [thread:$0]  %s4982_s0, 32, %s20_s13, [#allocation3]  }
  0x14   :  { %s4290_s28 = scalar_lea.hbm %s4983_s1, 1920 }
  0x15   :  { %p4291_p8 = scmp.ne.s32.totalorder %s4983_s1, %s4290_s28  ;;  %p4294_p9 = scmp.lt.u32.totalorder %s4290_s28, %s4983_s1 }
  0x17   :  { %p4296_p10 = pnand %p4294_p9, %p4291_p8 }
  0x19   :  { %4299 = shalt.err (!%p4296_p10)
}
  0x1a   :  { %s4300_s6 = scalar_lea.vmem %s4395_s15, 1920  ;;  %p4305_p12 = scmp.lt.s32.totalorder %s4395_s15, %s4395_s15 }
  0x1b   :  { %p4301_p11 = scmp.ne.s32.totalorder %s4395_s15, %s4300_s6  ;;  %p4306_p13 = scmp.lt.s32.totalorder %s4300_s6, %s4300_s6 }
  0x1d   :  { %p4307_p0 = por %p4306_p13, %p4305_p12 }
  0x1f   :  { %p4308_p1 = pnand %p4307_p0, %p4301_p11 }
  0x21   :  { %4311 = shalt.err (!%p4308_p1)
}
  0x22   :  { %s4366_s0 = smov 128   ;;  %s4367_s7 = smov 8  }
  0x23   :  { %34 = dma.hbm_to_vmem [thread:$0]  %s4983_s1, 1920, %s4395_s15, [#allocation6], %s4366_s0, %s4366_s0, %s4367_s7  }
  0x24   :  { %4356 = dma.done.wait [#allocation3], 32  }
  0x25   :  { %4357 = vsyncadd [#allocation3], 4294967264 }
  0x26   :  { %4358 = dma.done.wait [#allocation6], 1920  }
  0x27   :  { %4359 = vsyncadd [#allocation6], 4294965376  ;;  %v4368_v0 = vmov 0.0|0.0   ;;  %vm4369_vm0 = vmmov 0   ;;  %v4370_v1 = vmov 0.0   ;;  %v47_v2 = vld [vmem:[#allocation5 + $0x30] sm:$0xff] }
  0x28   :  { %4018 = vmatprep.subr.bf16.mxu0 %v4368_v0  ;;  %4025 = vmatprep.subr.bf16.mxu1 %v4368_v0  ;;  %v48_v3 = vld [vmem:[#allocation5 + $0x38] sm:$0xff]  ;;  %v49_v4 = vld [vmem:[#allocation5 + $0x40] sm:$0xff]  ;;  %v50_v6 = vld [vmem:[#allocation5 + $0x48] sm:$0x1]  ;;  %vm67_vm1 = vcmask 1040384   ;;  %vm4371_vm2 = vmmov 1  }
  0x29   :  { %3682 = vmatprep.mubr.msk.f32.mxu0 %vm4369_vm0, %v4370_v1  ;;  %3698 = vmatprep.mubr.msk.f32.mxu1 %vm4369_vm0, %v4370_v1  ;;  %v4432_v5 = vpack.c.bf16 %v48_v3, %v47_v2  ;;  %v4434_v7 = vld [vmem:[#allocation2] sm:$0x1]  ;;  %v4438_v9 = vpack.c.bf16 %v50_v6, %v49_v4  ;;  %vm4441_vm3 = vmpackc.low %vm67_vm1, %vm4371_vm2  ;;  %vm63_vm4 = vcmask 203776   ;;  %v4453_v12 = vld [vmem:[#allocation5 + $0x71] sm:$0x1]  ;;  %vm144_vm5 = vcmask 32768  }
  0x2a   :  { %v61_v8 = vmul.f32 0.01, %v4434_v7  ;;  %v4458_v25 = vld [vmem:[#allocation5 + $0x8] sm:$0x1f]  ;;  %vm160_vm6 = vcmask 1044480   ;;  %vm156_vm7 = vcmask 39936  }
  0x2b   :  { %4020 = vmatpush3.bf16.msra.mxu0 %v4432_v5  ;;  %v51_v29 = vld [vmem:[#allocation5 + $0x50] sm:$0xff]  ;;  %v52_v30 = vld [vmem:[#allocation5 + $0x58] sm:$0xff]  ;;  %v53_v32 = vld [vmem:[#allocation5 + $0x60] sm:$0xff]  ;;  %vm317_vm8 = vcmask 73768   ;;  %s4372_s1 = smov 123   ;;  %s4373_s10 = smov [#allocation8]  }
  0x2c   :  { %4021 = vmatprep.subr.bf16.mxu0 %v4368_v0  ;;  %v62_v11 = vmax.f32 %v4434_v7, %v61_v8  ;;  %v4466_v31 = vpack.c.bf16 %v52_v30, %v51_v29  ;;  %v54_v33 = vld [vmem:[#allocation5 + $0x68] sm:$0x1]  ;;  %v4476_v35 = vld [vmem:[#allocation2 + $0x1] sm:$0x1]  ;;  %v4485_v41 = vld [vmem:[#allocation5 + $0x72] sm:$0x1] }
  0x2d   :  { %v4470_v34 = vpack.c.bf16 %v54_v33, %v53_v32  ;;  %v4492_v55 = vld [vmem:[#allocation5] sm:$0x1f]  ;;  %v43_v60 = vld [vmem:[#allocation5 + $0x10] sm:$0xff]  ;;  %v44_v61 = vld [vmem:[#allocation5 + $0x18] sm:$0xff]  ;;  %s3428_s11 = sshll.u32 %s4373_s10, 4  ;;  %s3429_s11 = int_to_ptr.vmem [resolvable:$true] %s3428_s11 }
  0x2e   :  { %4027 = vmatpush3.bf16.msra.mxu1 %v4466_v31  ;;  %v4507_v62 = vpack.c.bf16 %v44_v61, %v43_v60  ;;  %v45_v63 = vld [vmem:[#allocation5 + $0x20] sm:$0xff]  ;;  %v46_v2 = vld [vmem:[#allocation5 + $0x28] sm:$0x1]  ;;  %s4312_s12 = scalar_lea.vmem %s3429_s11, 128  ;;  %p4317_p3 = scmp.lt.s32.totalorder %s3429_s11, %s3429_s11 }
  0x2f   :  { %4024 = vmatpush3.bf16.msk.msra.mxu0 %vm4441_vm3, %v4438_v9  ;;  %4028 = vmatprep.subr.bf16.mxu1 %v4368_v0  ;;  %v4511_v3 = vpack.c.bf16 %v46_v2, %v45_v63  ;;  %p4313_p2 = scmp.ne.s32.totalorder %s3429_s11, %s4312_s12  ;;  %p4318_p4 = scmp.lt.s32.totalorder %s4312_s12, %s4312_s12 }
  0x30   :  { %3685 = vmatprep.subr.mxu0 %v4370_v1 }
  0x31   :  { %p4319_p5 = por %p4318_p4, %p4317_p3 }
  0x32   :  { %3683 = vmatmul.mubr.msk.f32.vlgmr.msra.gmra.mrb[0].mxu0 %vm63_vm4, %v62_v11  ;;  %4031 = vmatpush3.bf16.msk.msra.mxu1 %vm4441_vm3, %v4470_v34 }
  0x33   :  { %3687 = vmatprep.mubr.msk.f32.mxu0 %vm4369_vm0, %v4370_v1  ;;  %3686 = vmatpush3.msk.msra.mxu0 %vm160_vm6, %v4458_v25  ;;  %p4320_p6 = pnand %p4319_p5, %p4313_p2 }
  0x34   :  { %3701 = vmatprep.subr.mxu0 %v4370_v1  ;;  %4032 = vmatprep.subr.bf16.mxu1 %v4368_v0 }
 0x105   :  { %v137_v13 = vpop.f32.mrb[0].mxu0 }
 0x106   :  { %v138_v14 = vadd.f32 %v137_v13, %v4453_v12  ;;  %v3684_v15 = vpop.f32.mrb[1].mxu0 }
 0x108   :  { %v141_v16 = vmul.f32 0.01, %v138_v14 }
 0x10a   :  { %v142_v17 = vmax.f32 %v138_v14, %v141_v16 }
 0x10c   :  { %v143_v18 = vmul.f32 35.0, %v142_v17 }
 0x10e   :  { %v145_v19 = vsel %vm144_vm5, %v143_v18, -inf }
 0x10f   :  { %146 = vmax.xlane.f32.xlu0 %v145_v19 }
 0x19c   :  { %v147_v20 = vpop.xlane.xlu0 %146 }
 0x19d   :  { %v148_v21 = vsub.f32 %v143_v18, %v147_v20  ;;  %v4538_v18 = vld [vmem:[#allocation5 + $0x70] sm:$0x1] }
 0x19f   :  { %v149_v22 = vmul.f32 1.442695, %v148_v21 }
 0x1a1   :  { %4197 = vpow2.f32 %v149_v22 }
 0x1ab   :  { %v4198_v23 = vpop.eup %4197 }
 0x1ac   :  { %v151_v24 = vsel %vm144_vm5, %v4198_v23, 0.0 }
 0x1ad   :  { %152 = vadd.xlane.f32.xlu0 %v151_v24 }
 0x23a   :  { %v153_v26 = vpop.xlane.xlu0 %152 }
 0x23b   :  { %4199 = vrcp.f32 %v153_v26 }
 0x245   :  { %v4200_v27 = vpop.eup %4199 }
 0x246   :  { %v155_v28 = vmul.f32 %v4200_v27, %v4198_v23 }
 0x248   :  { %3688 = vmatmul.mubr.msk.f32.vlgmr.msra.gmra.mrb[2].mxu0 %vm156_vm7, %v155_v28 }
 0x249   :  { %3703 = vmatprep.mubr.msk.f32.mxu0 %vm4369_vm0, %v4370_v1  ;;  %3702 = vmatpush3.msk.msra.mxu0 %vm160_vm6, %v4492_v55 }
 0x24a   :  { %4039 = vmatprep.subr.bf16.mxu0 %v4368_v0 }
 0x31b   :  { %v4478_v36 = vpop.f32.mrb[2].mxu0 }
 0x31c   :  { %v234_v37 = vadd.f32 %v4478_v36, %v4476_v35  ;;  %v3689_v38 = vpop.f32.mrb[3].mxu0 }
 0x31e   :  { %v235_v39 = vmul.f32 0.01, %v234_v37 }
 0x320   :  { %v236_v40 = vmax.f32 %v234_v37, %v235_v39 }
 0x322   :  { %3699 = vmatmul.mubr.msk.f32.vlgmr.msra.gmra.mrb[0].mxu1 %vm63_vm4, %v236_v40 }
 0x323   :  { %3714 = vmatprep.mubr.msk.f32.mxu1 %vm4369_vm0, %v4370_v1  ;;  %4034 = vmatpush3.bf16.msra.mxu1 %v4507_v62 }
 0x324   :  { %4035 = vmatprep.subr.bf16.mxu1 %v4368_v0 }
 0x327   :  { %4038 = vmatpush3.bf16.msk.msra.mxu1 %vm4441_vm3, %v4511_v3 }
 0x328   :  { %3728 = vmatprep.subr.mxu1 %v4370_v1 }
 0x3f5   :  { %v309_v42 = vpop.f32.mrb[0].mxu1 }
 0x3f6   :  { %v310_v43 = vadd.f32 %v309_v42, %v4485_v41  ;;  %v3700_v44 = vpop.f32.mrb[1].mxu1 }
 0x3f8   :  { %v313_v45 = vmul.f32 0.01, %v310_v43 }
 0x3fa   :  { %v314_v46 = vmax.f32 %v310_v43, %v313_v45 }
 0x3fc   :  { %315 = vst.msk [vmem:[#allocation8] sm:$0x1] %vm144_vm5, %v314_v46  ;;  %v316_v47 = vmul.f32 35.0, %v314_v46 }
 0x3fe   :  { %v318_v48 = vsel %vm317_vm8, %v316_v47, -inf }
 0x3ff   :  { %319 = vmax.xlane.f32.xlu1 %v318_v48 }
 0x48c   :  { %v320_v49 = vpop.xlane.xlu1 %319 }
 0x48d   :  { %v321_v50 = vsub.f32 %v316_v47, %v320_v49 }
 0x48f   :  { %v322_v51 = vmul.f32 1.442695, %v321_v50 }
 0x491   :  { %4201 = vpow2.f32 %v322_v51 }
 0x49b   :  { %v4202_v52 = vpop.eup %4201 }
 0x49c   :  { %325 = vrot.lane.b32.xlu1 %v4202_v52, %s4372_s1 }
 0x50e   :  { %v326_v53 = vpop.permute.xlu1 %325 }
 0x50f   :  { %v328_v54 = vsel %vm144_vm5, %v326_v53, 0.0 }
 0x510   :  { %329 = vadd.xlane.f32.xlu0 %v328_v54 }
 0x59d   :  { %v330_v56 = vpop.xlane.xlu0 %329 }
 0x59e   :  { %4203 = vrcp.f32 %v330_v56 }
 0x5a8   :  { %v4204_v57 = vpop.eup %4203 }
 0x5a9   :  { %v332_v58 = vmul.f32 %v4204_v57, %v4202_v52 }
 0x5ab   :  { %334 = vrot.lane.b32.xlu0 %v332_v58, %s4372_s1 }
 0x61d   :  { %v335_v59 = vpop.permute.xlu0 %334 }
 0x61e   :  { %3704 = vmatmul.mubr.msk.f32.vlgmr.msra.gmra.mrb[4].mxu0 %vm156_vm7, %v335_v59 }
 0x61f   :  { %4041 = vmatpush3.bf16.msra.mxu0 %v4432_v5  ;;  %3725 = vmatprep.mubr.msk.f32.mxu0 %vm4369_vm0, %v4370_v1 }
 0x620   :  { %4042 = vmatprep.subr.bf16.mxu0 %v4368_v0 }
 0x623   :  { %4045 = vmatpush3.bf16.msk.msra.mxu0 %vm4441_vm3, %v4438_v9 }
 0x624   :  { %4046 = vmatprep.subr.bf16.mxu0 %v4368_v0 }
 0x6f1   :  { %v4517_v4 = vpop.f32.mrb[4].mxu0 }
 0x6f2   :  { %v411_v6 = vadd.f32 %v4517_v4, %v4434_v7  ;;  %v493_v8 = vmul.f32 0.5, %v4517_v4  ;;  %v3705_v11 = vpop.f32.mrb[5].mxu0 }
 0x6f4   :  { %v412_v13 = vmul.f32 0.01, %v411_v6  ;;  %v494_v14 = vadd.f32 %v493_v8, %v4434_v7 }
 0x6f6   :  { %v413_v15 = vmax.f32 %v411_v6, %v412_v13  ;;  %v495_v16 = vmul.f32 0.01, %v494_v14 }
 0x6f8   :  { %v496_v17 = vmax.f32 %v494_v14, %v495_v16  ;;  %3715 = vmatmul.mubr.msk.f32.vlgmr.msra.gmra.mrb[2].mxu1 %vm63_vm4, %v413_v15 }
 0x6f9   :  { %3729 = vmatpush3.msk.msra.mxu1 %vm160_vm6, %v4458_v25  ;;  %3730 = vmatprep.mubr.msk.f32.mxu1 %vm4369_vm0, %v4370_v1 }
 0x6fa   :  { %3726 = vmatmul.mubr.msk.f32.vlgmr.msra.gmra.mrb[6].mxu0 %vm63_vm4, %v496_v17  ;;  %3744 = vmatprep.subr.mxu1 %v4370_v1 }
 0x6fb   :  { %4048 = vmatpush3.bf16.msra.mxu0 %v4466_v31  ;;  %3741 = vmatprep.mubr.msk.f32.mxu0 %vm4369_vm0, %v4370_v1 }
 0x6fc   :  { %4049 = vmatprep.subr.bf16.mxu0 %v4368_v0 }
 0x6ff   :  { %4052 = vmatpush3.bf16.msk.msra.mxu0 %vm4441_vm3, %v4470_v34 }
 0x700   :  { %4060 = vmatprep.subr.bf16.mxu0 %v4368_v0 }
 0x7cb   :  { %v486_v19 = vpop.f32.mrb[2].mxu1 }
 0x7cc   :  { %v487_v20 = vadd.f32 %v486_v19, %v4538_v18  ;;  %v3716_v21 = vpop.f32.mrb[3].mxu1 }
 0x7cd   :  { %v566_v22 = vpop.f32.mrb[6].mxu0 }
 0x7ce   :  { %v490_v23 = vmul.f32 0.01, %v487_v20  ;;  %v567_v24 = vadd.f32 %v566_v22, %v4453_v12  ;;  %v3727_v26 = vpop.f32.mrb[7].mxu0 }
 0x7d0   :  { %v491_v27 = vmax.f32 %v487_v20, %v490_v23  ;;  %v570_v28 = vmul.f32 0.01, %v567_v24 }
 0x7d2   :  { %492 = vst.msk [vmem:[#allocation7] sm:$0x1] %vm144_vm5, %v491_v27  ;;  %v571_v29 = vmax.f32 %v567_v24, %v570_v28 }
 0x7d4   :  { %v572_v30 = vmul.f32 35.0, %v571_v29 }
 0x7d6   :  { %v573_v32 = vsel %vm144_vm5, %v572_v30, -inf }
 0x7d7   :  { %574 = vmax.xlane.f32.xlu1 %v573_v32 }
 0x864   :  { %v575_v33 = vpop.xlane.xlu1 %574 }
 0x865   :  { %v576_v37 = vsub.f32 %v572_v30, %v575_v33 }
 0x867   :  { %v577_v38 = vmul.f32 1.442695, %v576_v37 }
 0x869   :  { %4205 = vpow2.f32 %v577_v38 }
 0x873   :  { %v4206_v39 = vpop.eup %4205 }
 0x874   :  { %v579_v40 = vsel %vm144_vm5, %v4206_v39, 0.0 }
 0x875   :  { %580 = vadd.xlane.f32.xlu0 %v579_v40 }
 0x902   :  { %v581_v42 = vpop.xlane.xlu0 %580 }
 0x903   :  { %4207 = vrcp.f32 %v581_v42 }
 0x90d   :  { %v4208_v43 = vpop.eup %4207 }
 0x90e   :  { %v583_v44 = vmul.f32 %v4208_v43, %v4206_v39 }
 0x910   :  { %3731 = vmatmul.mubr.msk.f32.vlgmr.msra.gmra.mrb[4].mxu1 %vm156_vm7, %v583_v44 }
 0x911   :  { %3745 = vmatpush3.msk.msra.mxu1 %vm160_vm6, %v4492_v55  ;;  %3746 = vmatprep.mubr.msk.f32.mxu1 %vm4369_vm0, %v4370_v1 }
 0x912   :  { %4053 = vmatprep.subr.bf16.mxu1 %v4368_v0 }
 0x9e3   :  { %v653_v45 = vpop.f32.mrb[4].mxu1 }
 0x9e4   :  { %v4552_v46 = vadd.f32 %v653_v45, %v4478_v36  ;;  %v3732_v47 = vpop.f32.mrb[5].mxu1 }
 0x9e6   :  { %v658_v48 = vmul.f32 0.5, %v4552_v46 }
 0x9e8   :  { %v659_v49 = vadd.f32 %v658_v48, %v4476_v35 }
 0x9ea   :  { %v660_v50 = vmul.f32 0.01, %v659_v49 }
 0x9ec   :  { %v661_v51 = vmax.f32 %v659_v49, %v660_v50 }
 0x9ee   :  { %3742 = vmatmul.mubr.msk.f32.vlgmr.msra.gmra.mrb[8].mxu0 %vm63_vm4, %v661_v51 }
 0x9ef   :  { %4062 = vmatpush3.bf16.msra.mxu0 %v4432_v5  ;;  %3768 = vmatprep.mubr.msk.f32.mxu0 %vm4369_vm0, %v4370_v1 }
 0x9f0   :  { %4063 = vmatprep.subr.bf16.mxu0 %v4368_v0 }
 0x9f3   :  { %4066 = vmatpush3.bf16.msk.msra.mxu0 %vm4441_vm3, %v4438_v9 }
 0x9f4   :  { %4067 = vmatprep.subr.bf16.mxu0 %v4368_v0 }
 0xac1   :  { %v731_v36 = vpop.f32.mrb[8].mxu0 }
 0xac2   :  { %v732_v52 = vadd.f32 %v731_v36, %v4485_v41  ;;  %v3743_v53 = vpop.f32.mrb[9].mxu0 }
 0xac4   :  { %v735_v54 = vmul.f32 0.01, %v732_v52 }
 0xac6   :  { %v736_v56 = vmax.f32 %v732_v52, %v735_v54 }
 0xac8   :  { %737 = vst.msk [vmem:[#allocation8 + $0x1] sm:$0x1] %vm144_vm5, %v736_v56  ;;  %v738_v57 = vmul.f32 35.0, %v736_v56 }
 0xaca   :  { %v739_v58 = vsel %vm317_vm8, %v738_v57, -inf }
 0xacb   :  { %740 = vmax.xlane.f32.xlu1 %v739_v58 }
 0xb58   :  { %v741_v59 = vpop.xlane.xlu1 %740 }
 0xb59   :  { %v742_v60 = vsub.f32 %v738_v57, %v741_v59 }
 0xb5b   :  { %v743_v61 = vmul.f32 1.442695, %v742_v60 }
 0xb5d   :  { %4209 = vpow2.f32 %v743_v61 }
 0xb67   :  { %v4210_v63 = vpop.eup %4209 }
 0xb68   :  { %746 = vrot.lane.b32.xlu1 %v4210_v63, %s4372_s1 }
 0xbda   :  { %v747_v2 = vpop.permute.xlu1 %746 }
 0xbdb   :  { %v749_v6 = vsel %vm144_vm5, %v747_v2, 0.0 }
 0xbdc   :  { %750 = vadd.xlane.f32.xlu0 %v749_v6 }
 0xc69   :  { %v751_v8 = vpop.xlane.xlu0 %750 }
 0xc6a   :  { %4211 = vrcp.f32 %v751_v8 }
 0xc74   :  { %v4212_v11 = vpop.eup %4211 }
 0xc75   :  { %v753_v13 = vmul.f32 %v4212_v11, %v4210_v63 }
 0xc77   :  { %755 = vrot.lane.b32.xlu0 %v753_v13, %s4372_s1 }
 0xce9   :  { %v756_v14 = vpop.permute.xlu0 %755 }
 0xcea   :  { %3747 = vmatmul.mubr.msk.f32.vlgmr.msra.gmra.mrb[6].mxu1 %vm156_vm7, %v756_v14 }
 0xceb   :  { %4055 = vmatpush3.bf16.msra.mxu1 %v4507_v62  ;;  %3757 = vmatprep.mubr.msk.f32.mxu1 %vm4369_vm0, %v4370_v1 }
 0xcec   :  { %4056 = vmatprep.subr.bf16.mxu1 %v4368_v0 }
 0xcef   :  { %4059 = vmatpush3.bf16.msk.msra.mxu1 %vm4441_vm3, %v4511_v3 }
 0xcf0   :  { %3771 = vmatprep.subr.mxu1 %v4370_v1 }
 0xdbd   :  { %v825_v15 = vpop.f32.mrb[6].mxu1 }
 0xdbe   :  { %v4581_v16 = vadd.f32 %v825_v15, %v4517_v4  ;;  %v3748_v17 = vpop.f32.mrb[7].mxu1 }
 0xdc0   :  { %v830_v19 = vmul.f32 0.5, %v4581_v16  ;;  %v910_v20 = vmul.f32 0.33333334, %v4581_v16 }
 0xdc2   :  { %v831_v21 = vadd.f32 %v830_v19, %v4434_v7  ;;  %v911_v22 = vadd.f32 %v910_v20, %v4434_v7 }
 0xdc4   :  { %v832_v23 = vmul.f32 0.01, %v831_v21  ;;  %v912_v24 = vmul.f32 0.01, %v911_v22 }
 0xdc6   :  { %v833_v26 = vmax.f32 %v831_v21, %v832_v23  ;;  %v913_v27 = vmax.f32 %v911_v22, %v912_v24 }
 0xdc8   :  { %3758 = vmatmul.mubr.msk.f32.vlgmr.msra.gmra.mrb[8].mxu1 %vm63_vm4, %v833_v26  ;;  %3769 = vmatmul.mubr.msk.f32.vlgmr.msra.gmra.mrb[10].mxu0 %vm63_vm4, %v913_v27 }
 0xdc9   :  { %3772 = vmatpush3.msk.msra.mxu1 %vm160_vm6, %v4458_v25  ;;  %3773 = vmatprep.mubr.msk.f32.mxu1 %vm4369_vm0, %v4370_v1 }
 0xdca   :  { %4069 = vmatpush3.bf16.msra.mxu0 %v4466_v31  ;;  %3784 = vmatprep.mubr.msk.f32.mxu0 %vm4369_vm0, %v4370_v1 }
 0xdcb   :  { %4070 = vmatprep.subr.bf16.mxu0 %v4368_v0  ;;  %3787 = vmatprep.subr.mxu1 %v4370_v1 }
 0xdce   :  { %4073 = vmatpush3.bf16.msk.msra.mxu0 %vm4441_vm3, %v4470_v34 }
 0xdcf   :  { %4081 = vmatprep.subr.bf16.mxu0 %v4368_v0 }
 0xe9b   :  { %v903_v4 = vpop.f32.mrb[8].mxu1  ;;  %v983_v28 = vpop.f32.mrb[10].mxu0 }
 0xe9c   :  { %v904_v29 = vadd.f32 %v903_v4, %v4538_v18  ;;  %v984_v30 = vadd.f32 %v983_v28, %v4453_v12  ;;  %v3759_v32 = vpop.f32.mrb[9].mxu1  ;;  %v3770_v33 = vpop.f32.mrb[11].mxu0 }
 0xe9e   :  { %v907_v37 = vmul.f32 0.01, %v904_v29  ;;  %v987_v38 = vmul.f32 0.01, %v984_v30 }
 0xea0   :  { %v908_v39 = vmax.f32 %v904_v29, %v907_v37  ;;  %v988_v40 = vmax.f32 %v984_v30, %v987_v38 }
 0xea2   :  { %909 = vst.msk [vmem:[#allocation7 + $0x1] sm:$0x1] %vm144_vm5, %v908_v39  ;;  %v989_v42 = vmul.f32 35.0, %v988_v40 }
 0xea4   :  { %v990_v43 = vsel %vm144_vm5, %v989_v42, -inf }
 0xea5   :  { %991 = vmax.xlane.f32.xlu1 %v990_v43 }
 0xf32   :  { %v992_v44 = vpop.xlane.xlu1 %991 }
 0xf33   :  { %v993_v45 = vsub.f32 %v989_v42, %v992_v44 }
 0xf35   :  { %v994_v47 = vmul.f32 1.442695, %v993_v45 }
 0xf37   :  { %4213 = vpow2.f32 %v994_v47 }
 0xf41   :  { %v4214_v48 = vpop.eup %4213 }
 0xf42   :  { %v996_v49 = vsel %vm144_vm5, %v4214_v48, 0.0 }
 0xf43   :  { %997 = vadd.xlane.f32.xlu0 %v996_v49 }
 0xfd0   :  { %v998_v50 = vpop.xlane.xlu0 %997 }
 0xfd1   :  { %4215 = vrcp.f32 %v998_v50 }
 0xfdb   :  { %v4216_v51 = vpop.eup %4215 }
 0xfdc   :  { %v1000_v36 = vmul.f32 %v4216_v51, %v4214_v48 }
 0xfde   :  { %3774 = vmatmul.mubr.msk.f32.vlgmr.msra.gmra.mrb[10].mxu1 %vm156_vm7, %v1000_v36 }
 0xfdf   :  { %3788 = vmatpush3.msk.msra.mxu1 %vm160_vm6, %v4492_v55  ;;  %3789 = vmatprep.mubr.msk.f32.mxu1 %vm4369_vm0, %v4370_v1 }
 0xfe0   :  { %4074 = vmatprep.subr.bf16.mxu1 %v4368_v0 }
0x10b1   :  { %v1070_v52 = vpop.f32.mrb[10].mxu1 }
0x10b2   :  { %v4614_v53 = vadd.f32 %v1070_v52, %v4552_v46  ;;  %v3775_v54 = vpop.f32.mrb[11].mxu1 }
0x10b4   :  { %v1075_v56 = vmul.f32 0.33333334, %v4614_v53 }
0x10b6   :  { %v1076_v57 = vadd.f32 %v1075_v56, %v4476_v35 }
0x10b8   :  { %v1077_v58 = vmul.f32 0.01, %v1076_v57 }
0x10ba   :  { %v1078_v59 = vmax.f32 %v1076_v57, %v1077_v58 }
0x10bc   :  { %3785 = vmatmul.mubr.msk.f32.vlgmr.msra.gmra.mrb[12].mxu0 %vm63_vm4, %v1078_v59 }
0x10bd   :  { %4083 = vmatpush3.bf16.msra.mxu0 %v4432_v5  ;;  %3811 = vmatprep.mubr.msk.f32.mxu0 %vm4369_vm0, %v4370_v1 }
0x10be   :  { %4084 = vmatprep.subr.bf16.mxu0 %v4368_v0 }
0x10c1   :  { %4087 = vmatpush3.bf16.msk.msra.mxu0 %vm4441_vm3, %v4438_v9 }
0x10c2   :  { %4088 = vmatprep.subr.bf16.mxu0 %v4368_v0 }
0x118f   :  { %v1148_v46 = vpop.f32.mrb[12].mxu0 }
0x1190   :  { %v1149_v60 = vadd.f32 %v1148_v46, %v4485_v41  ;;  %v3786_v61 = vpop.f32.mrb[13].mxu0 }
0x1192   :  { %v1152_v63 = vmul.f32 0.01, %v1149_v60 }
0x1194   :  { %v1153_v2 = vmax.f32 %v1149_v60, %v1152_v63 }
0x1196   :  { %1154 = vst.msk [vmem:[#allocation8 + $0x2] sm:$0x1] %vm144_vm5, %v1153_v2  ;;  %v1155_v6 = vmul.f32 35.0, %v1153_v2 }
0x1198   :  { %v1156_v8 = vsel %vm317_vm8, %v1155_v6, -inf }
0x1199   :  { %1157 = vmax.xlane.f32.xlu1 %v1156_v8 }
0x1226   :  { %v1158_v11 = vpop.xlane.xlu1 %1157 }
0x1227   :  { %v1159_v13 = vsub.f32 %v1155_v6, %v1158_v11 }
0x1229   :  { %v1160_v14 = vmul.f32 1.442695, %v1159_v13 }
0x122b   :  { %4217 = vpow2.f32 %v1160_v14 }
0x1235   :  { %v4218_v15 = vpop.eup %4217 }
0x1236   :  { %1163 = vrot.lane.b32.xlu1 %v4218_v15, %s4372_s1 }
0x12a8   :  { %v1164_v17 = vpop.permute.xlu1 %1163 }
0x12a9   :  { %v1166_v19 = vsel %vm144_vm5, %v1164_v17, 0.0 }
0x12aa   :  { %1167 = vadd.xlane.f32.xlu0 %v1166_v19 }
0x1337   :  { %v1168_v20 = vpop.xlane.xlu0 %1167 }
0x1338   :  { %4219 = vrcp.f32 %v1168_v20 }
0x1342   :  { %v4220_v21 = vpop.eup %4219 }
0x1343   :  { %v1170_v22 = vmul.f32 %v4220_v21, %v4218_v15 }
0x1345   :  { %1172 = vrot.lane.b32.xlu0 %v1170_v22, %s4372_s1 }
0x13b7   :  { %v1173_v23 = vpop.permute.xlu0 %1172 }
0x13b8   :  { %3790 = vmatmul.mubr.msk.f32.vlgmr.msra.gmra.mrb[12].mxu1 %vm156_vm7, %v1173_v23 }
0x13b9   :  { %4076 = vmatpush3.bf16.msra.mxu1 %v4507_v62  ;;  %3800 = vmatprep.mubr.msk.f32.mxu1 %vm4369_vm0, %v4370_v1 }
0x13ba   :  { %4077 = vmatprep.subr.bf16.mxu1 %v4368_v0 }
0x13bd   :  { %4080 = vmatpush3.bf16.msk.msra.mxu1 %vm4441_vm3, %v4511_v3 }
0x13be   :  { %3814 = vmatprep.subr.mxu1 %v4370_v1 }
0x148b   :  { %v1242_v24 = vpop.f32.mrb[12].mxu1 }
0x148c   :  { %v4643_v26 = vadd.f32 %v1242_v24, %v4581_v16  ;;  %v3791_v27 = vpop.f32.mrb[13].mxu1 }
0x148e   :  { %v1247_v4 = vmul.f32 0.33333334, %v4643_v26  ;;  %v1327_v28 = vmul.f32 0.25, %v4643_v26 }
0x1490   :  { %v1248_v29 = vadd.f32 %v1247_v4, %v4434_v7  ;;  %v1328_v30 = vadd.f32 %v1327_v28, %v4434_v7 }
0x1492   :  { %v1249_v32 = vmul.f32 0.01, %v1248_v29  ;;  %v1329_v33 = vmul.f32 0.01, %v1328_v30 }
0x1494   :  { %v1250_v37 = vmax.f32 %v1248_v29, %v1249_v32  ;;  %v1330_v38 = vmax.f32 %v1328_v30, %v1329_v33 }
0x1496   :  { %3801 = vmatmul.mubr.msk.f32.vlgmr.msra.gmra.mrb[14].mxu1 %vm63_vm4, %v1250_v37  ;;  %3812 = vmatmul.mubr.msk.f32.vlgmr.msra.gmra.mrb[14].mxu0 %vm63_vm4, %v1330_v38 }
0x1497   :  { %3815 = vmatpush3.msk.msra.mxu1 %vm160_vm6, %v4458_v25  ;;  %3816 = vmatprep.mubr.msk.f32.mxu1 %vm4369_vm0, %v4370_v1 }
0x1498   :  { %4090 = vmatpush3.bf16.msra.mxu0 %v4466_v31  ;;  %3827 = vmatprep.mubr.msk.f32.mxu0 %vm4369_vm0, %v4370_v1 }
0x1499   :  { %4091 = vmatprep.subr.bf16.mxu0 %v4368_v0  ;;  %3830 = vmatprep.subr.mxu1 %v4370_v1 }
0x149c   :  { %4094 = vmatpush3.bf16.msk.msra.mxu0 %vm4441_vm3, %v4470_v34 }
0x149d   :  { %4102 = vmatprep.subr.bf16.mxu0 %v4368_v0 }
0x1569   :  { %v1320_v16 = vpop.f32.mrb[14].mxu1  ;;  %v1400_v39 = vpop.f32.mrb[14].mxu0 }
0x156a   :  { %v1321_v40 = vadd.f32 %v1320_v16, %v4538_v18  ;;  %v1401_v42 = vadd.f32 %v1400_v39, %v4453_v12  ;;  %v3802_v43 = vpop.f32.mrb[15].mxu1  ;;  %v3813_v44 = vpop.f32.mrb[15].mxu0 }
0x156c   :  { %v1324_v45 = vmul.f32 0.01, %v1321_v40  ;;  %v1404_v47 = vmul.f32 0.01, %v1401_v42 }
0x156e   :  { %v1325_v48 = vmax.f32 %v1321_v40, %v1324_v45  ;;  %v1405_v49 = vmax.f32 %v1401_v42, %v1404_v47 }
0x1570   :  { %1326 = vst.msk [vmem:[#allocation7 + $0x2] sm:$0x1] %vm144_vm5, %v1325_v48  ;;  %v1406_v50 = vmul.f32 35.0, %v1405_v49 }
0x1572   :  { %v1407_v51 = vsel %vm144_vm5, %v1406_v50, -inf }
0x1573   :  { %1408 = vmax.xlane.f32.xlu1 %v1407_v51 }
0x1600   :  { %v1409_v36 = vpop.xlane.xlu1 %1408 }
0x1601   :  { %v1410_v52 = vsub.f32 %v1406_v50, %v1409_v36 }
0x1603   :  { %v1411_v54 = vmul.f32 1.442695, %v1410_v52 }
0x1605   :  { %4221 = vpow2.f32 %v1411_v54 }
0x160f   :  { %v4222_v56 = vpop.eup %4221 }
0x1610   :  { %v1413_v57 = vsel %vm144_vm5, %v4222_v56, 0.0 }
0x1611   :  { %1414 = vadd.xlane.f32.xlu0 %v1413_v57 }
0x169e   :  { %v1415_v58 = vpop.xlane.xlu0 %1414 }
0x169f   :  { %4223 = vrcp.f32 %v1415_v58 }
0x16a9   :  { %v4224_v59 = vpop.eup %4223 }
0x16aa   :  { %v1417_v46 = vmul.f32 %v4224_v59, %v4222_v56 }
0x16ac   :  { %3817 = vmatmul.mubr.msk.f32.vlgmr.msra.gmra.mrb[16].mxu1 %vm156_vm7, %v1417_v46 }
0x16ad   :  { %3831 = vmatpush3.msk.msra.mxu1 %vm160_vm6, %v4492_v55  ;;  %3832 = vmatprep.mubr.msk.f32.mxu1 %vm4369_vm0, %v4370_v1 }
0x16ae   :  { %4095 = vmatprep.subr.bf16.mxu1 %v4368_v0 }
0x177f   :  { %v1487_v60 = vpop.f32.mrb[16].mxu1 }
0x1780   :  { %v4676_v61 = vadd.f32 %v1487_v60, %v4614_v53  ;;  %v3818_v63 = vpop.f32.mrb[17].mxu1 }
0x1782   :  { %v1492_v2 = vmul.f32 0.25, %v4676_v61 }
0x1784   :  { %v1493_v6 = vadd.f32 %v1492_v2, %v4476_v35 }
0x1786   :  { %v1494_v8 = vmul.f32 0.01, %v1493_v6 }
0x1788   :  { %v1495_v11 = vmax.f32 %v1493_v6, %v1494_v8 }
0x178a   :  { %3828 = vmatmul.mubr.msk.f32.vlgmr.msra.gmra.mrb[16].mxu0 %vm63_vm4, %v1495_v11 }
0x178b   :  { %4104 = vmatpush3.bf16.msra.mxu0 %v4432_v5  ;;  %3854 = vmatprep.mubr.msk.f32.mxu0 %vm4369_vm0, %v4370_v1 }
0x178c   :  { %4105 = vmatprep.subr.bf16.mxu0 %v4368_v0 }
0x178f   :  { %4108 = vmatpush3.bf16.msk.msra.mxu0 %vm4441_vm3, %v4438_v9 }
0x1790   :  { %4109 = vmatprep.subr.bf16.mxu0 %v4368_v0 }
0x185d   :  { %v1565_v53 = vpop.f32.mrb[16].mxu0 }
0x185e   :  { %v1566_v13 = vadd.f32 %v1565_v53, %v4485_v41  ;;  %v3829_v14 = vpop.f32.mrb[17].mxu0 }
0x1860   :  { %v1569_v15 = vmul.f32 0.01, %v1566_v13 }
0x1862   :  { %v1570_v17 = vmax.f32 %v1566_v13, %v1569_v15 }
0x1864   :  { %1571 = vst.msk [vmem:[#allocation8 + $0x3] sm:$0x1] %vm144_vm5, %v1570_v17  ;;  %v1572_v19 = vmul.f32 35.0, %v1570_v17 }
0x1866   :  { %v1573_v20 = vsel %vm317_vm8, %v1572_v19, -inf }
0x1867   :  { %1574 = vmax.xlane.f32.xlu1 %v1573_v20 }
0x18f4   :  { %v1575_v21 = vpop.xlane.xlu1 %1574 }
0x18f5   :  { %v1576_v22 = vsub.f32 %v1572_v19, %v1575_v21 }
0x18f7   :  { %v1577_v23 = vmul.f32 1.442695, %v1576_v22 }
0x18f9   :  { %4225 = vpow2.f32 %v1577_v23 }
0x1903   :  { %v4226_v24 = vpop.eup %4225 }
0x1904   :  { %1580 = vrot.lane.b32.xlu1 %v4226_v24, %s4372_s1 }
0x1976   :  { %v1581_v27 = vpop.permute.xlu1 %1580 }
0x1977   :  { %v1583_v4 = vsel %vm144_vm5, %v1581_v27, 0.0 }
0x1978   :  { %1584 = vadd.xlane.f32.xlu0 %v1583_v4 }
0x1a05   :  { %v1585_v28 = vpop.xlane.xlu0 %1584 }
0x1a06   :  { %4227 = vrcp.f32 %v1585_v28 }
0x1a10   :  { %v4228_v29 = vpop.eup %4227 }
0x1a11   :  { %v1587_v30 = vmul.f32 %v4228_v29, %v4226_v24 }
0x1a13   :  { %1589 = vrot.lane.b32.xlu0 %v1587_v30, %s4372_s1 }
0x1a85   :  { %v1590_v32 = vpop.permute.xlu0 %1589 }
0x1a86   :  { %3833 = vmatmul.mubr.msk.f32.vlgmr.msra.gmra.mrb[18].mxu1 %vm156_vm7, %v1590_v32 }
0x1a87   :  { %4097 = vmatpush3.bf16.msra.mxu1 %v4507_v62  ;;  %3843 = vmatprep.mubr.msk.f32.mxu1 %vm4369_vm0, %v4370_v1 }
0x1a88   :  { %4098 = vmatprep.subr.bf16.mxu1 %v4368_v0 }
0x1a8b   :  { %4101 = vmatpush3.bf16.msk.msra.mxu1 %vm4441_vm3, %v4511_v3 }
0x1a8c   :  { %3857 = vmatprep.subr.mxu1 %v4370_v1 }
0x1b59   :  { %v1659_v33 = vpop.f32.mrb[18].mxu1 }
0x1b5a   :  { %v4705_v37 = vadd.f32 %v1659_v33, %v4643_v26  ;;  %v3834_v38 = vpop.f32.mrb[19].mxu1 }
0x1b5c   :  { %v1664_v16 = vmul.f32 0.25, %v4705_v37  ;;  %v1744_v39 = vmul.f32 0.2, %v4705_v37 }
0x1b5e   :  { %v1665_v40 = vadd.f32 %v1664_v16, %v4434_v7  ;;  %v1745_v42 = vadd.f32 %v1744_v39, %v4434_v7 }
0x1b60   :  { %v1666_v43 = vmul.f32 0.01, %v1665_v40  ;;  %v1746_v44 = vmul.f32 0.01, %v1745_v42 }
0x1b62   :  { %v1667_v45 = vmax.f32 %v1665_v40, %v1666_v43  ;;  %v1747_v47 = vmax.f32 %v1745_v42, %v1746_v44 }
0x1b64   :  { %3844 = vmatmul.mubr.msk.f32.vlgmr.msra.gmra.mrb[20].mxu1 %vm63_vm4, %v1667_v45  ;;  %3855 = vmatmul.mubr.msk.f32.vlgmr.msra.gmra.mrb[18].mxu0 %vm63_vm4, %v1747_v47 }
0x1b65   :  { %3858 = vmatpush3.msk.msra.mxu1 %vm160_vm6, %v4458_v25  ;;  %3859 = vmatprep.mubr.msk.f32.mxu1 %vm4369_vm0, %v4370_v1 }
0x1b66   :  { %4111 = vmatpush3.bf16.msra.mxu0 %v4466_v31  ;;  %3870 = vmatprep.mubr.msk.f32.mxu0 %vm4369_vm0, %v4370_v1 }
0x1b67   :  { %4112 = vmatprep.subr.bf16.mxu0 %v4368_v0  ;;  %3873 = vmatprep.subr.mxu1 %v4370_v1 }
0x1b6a   :  { %4115 = vmatpush3.bf16.msk.msra.mxu0 %vm4441_vm3, %v4470_v34 }
0x1b6b   :  { %4123 = vmatprep.subr.bf16.mxu0 %v4368_v0 }
0x1c37   :  { %v1737_v26 = vpop.f32.mrb[20].mxu1  ;;  %v1817_v48 = vpop.f32.mrb[18].mxu0 }
0x1c38   :  { %v1738_v49 = vadd.f32 %v1737_v26, %v4538_v18  ;;  %v1818_v50 = vadd.f32 %v1817_v48, %v4453_v12  ;;  %v3845_v51 = vpop.f32.mrb[21].mxu1  ;;  %v3856_v36 = vpop.f32.mrb[19].mxu0 }
0x1c3a   :  { %v1741_v52 = vmul.f32 0.01, %v1738_v49  ;;  %v1821_v54 = vmul.f32 0.01, %v1818_v50 }
0x1c3c   :  { %v1742_v56 = vmax.f32 %v1738_v49, %v1741_v52  ;;  %v1822_v57 = vmax.f32 %v1818_v50, %v1821_v54 }
0x1c3e   :  { %1743 = vst.msk [vmem:[#allocation7 + $0x3] sm:$0x1] %vm144_vm5, %v1742_v56  ;;  %v1823_v58 = vmul.f32 35.0, %v1822_v57 }
0x1c40   :  { %v1824_v59 = vsel %vm144_vm5, %v1823_v58, -inf }
0x1c41   :  { %1825 = vmax.xlane.f32.xlu1 %v1824_v59 }
0x1cce   :  { %v1826_v46 = vpop.xlane.xlu1 %1825 }
0x1ccf   :  { %v1827_v60 = vsub.f32 %v1823_v58, %v1826_v46 }
0x1cd1   :  { %v1828_v63 = vmul.f32 1.442695, %v1827_v60 }
0x1cd3   :  { %4229 = vpow2.f32 %v1828_v63 }
0x1cdd   :  { %v4230_v2 = vpop.eup %4229 }
0x1cde   :  { %v1830_v6 = vsel %vm144_vm5, %v4230_v2, 0.0 }
0x1cdf   :  { %1831 = vadd.xlane.f32.xlu0 %v1830_v6 }
0x1d6c   :  { %v1832_v8 = vpop.xlane.xlu0 %1831 }
0x1d6d   :  { %4231 = vrcp.f32 %v1832_v8 }
0x1d77   :  { %v4232_v11 = vpop.eup %4231 }
0x1d78   :  { %v1834_v53 = vmul.f32 %v4232_v11, %v4230_v2 }
0x1d7a   :  { %3860 = vmatmul.mubr.msk.f32.vlgmr.msra.gmra.mrb[22].mxu1 %vm156_vm7, %v1834_v53 }
0x1d7b   :  { %3874 = vmatpush3.msk.msra.mxu1 %vm160_vm6, %v4492_v55  ;;  %3875 = vmatprep.mubr.msk.f32.mxu1 %vm4369_vm0, %v4370_v1 }
0x1d7c   :  { %4116 = vmatprep.subr.bf16.mxu1 %v4368_v0 }
0x1e4d   :  { %v1904_v13 = vpop.f32.mrb[22].mxu1 }
0x1e4e   :  { %v4738_v14 = vadd.f32 %v1904_v13, %v4676_v61  ;;  %v3861_v15 = vpop.f32.mrb[23].mxu1 }
0x1e50   :  { %v1909_v17 = vmul.f32 0.2, %v4738_v14 }
0x1e52   :  { %v1910_v19 = vadd.f32 %v1909_v17, %v4476_v35 }
0x1e54   :  { %v1911_v20 = vmul.f32 0.01, %v1910_v19 }
0x1e56   :  { %v1912_v21 = vmax.f32 %v1910_v19, %v1911_v20 }
0x1e58   :  { %3871 = vmatmul.mubr.msk.f32.vlgmr.msra.gmra.mrb[20].mxu0 %vm63_vm4, %v1912_v21 }
0x1e59   :  { %4125 = vmatpush3.bf16.msra.mxu0 %v4432_v5  ;;  %3897 = vmatprep.mubr.msk.f32.mxu0 %vm4369_vm0, %v4370_v1 }
0x1e5a   :  { %4126 = vmatprep.subr.bf16.mxu0 %v4368_v0 }
0x1e5d   :  { %4129 = vmatpush3.bf16.msk.msra.mxu0 %vm4441_vm3, %v4438_v9 }
0x1e5e   :  { %4130 = vmatprep.subr.bf16.mxu0 %v4368_v0 }
0x1f2b   :  { %v1982_v61 = vpop.f32.mrb[20].mxu0 }
0x1f2c   :  { %v1983_v22 = vadd.f32 %v1982_v61, %v4485_v41  ;;  %v3872_v23 = vpop.f32.mrb[21].mxu0 }
0x1f2e   :  { %v1986_v24 = vmul.f32 0.01, %v1983_v22 }
0x1f30   :  { %v1987_v27 = vmax.f32 %v1983_v22, %v1986_v24 }
0x1f32   :  { %1988 = vst.msk [vmem:[#allocation8 + $0x4] sm:$0x1] %vm144_vm5, %v1987_v27  ;;  %v1989_v4 = vmul.f32 35.0, %v1987_v27 }
0x1f34   :  { %v1990_v28 = vsel %vm317_vm8, %v1989_v4, -inf }
0x1f35   :  { %1991 = vmax.xlane.f32.xlu1 %v1990_v28 }
0x1fc2   :  { %v1992_v29 = vpop.xlane.xlu1 %1991 }
0x1fc3   :  { %v1993_v30 = vsub.f32 %v1989_v4, %v1992_v29 }
0x1fc5   :  { %v1994_v32 = vmul.f32 1.442695, %v1993_v30 }
0x1fc7   :  { %4233 = vpow2.f32 %v1994_v32 }
0x1fd1   :  { %v4234_v33 = vpop.eup %4233 }
0x1fd2   :  { %1997 = vrot.lane.b32.xlu1 %v4234_v33, %s4372_s1 }
0x2044   :  { %v1998_v38 = vpop.permute.xlu1 %1997 }
0x2045   :  { %v2000_v16 = vsel %vm144_vm5, %v1998_v38, 0.0 }
0x2046   :  { %2001 = vadd.xlane.f32.xlu0 %v2000_v16 }
0x20d3   :  { %v2002_v39 = vpop.xlane.xlu0 %2001 }
0x20d4   :  { %4235 = vrcp.f32 %v2002_v39 }
0x20de   :  { %v4236_v40 = vpop.eup %4235 }
0x20df   :  { %v2004_v42 = vmul.f32 %v4236_v40, %v4234_v33 }
0x20e1   :  { %2006 = vrot.lane.b32.xlu0 %v2004_v42, %s4372_s1 }
0x2153   :  { %v2007_v43 = vpop.permute.xlu0 %2006 }
0x2154   :  { %3876 = vmatmul.mubr.msk.f32.vlgmr.msra.gmra.mrb[24].mxu1 %vm156_vm7, %v2007_v43 }
0x2155   :  { %4118 = vmatpush3.bf16.msra.mxu1 %v4507_v62  ;;  %3886 = vmatprep.mubr.msk.f32.mxu1 %vm4369_vm0, %v4370_v1 }
0x2156   :  { %4119 = vmatprep.subr.bf16.mxu1 %v4368_v0 }
0x2159   :  { %4122 = vmatpush3.bf16.msk.msra.mxu1 %vm4441_vm3, %v4511_v3 }
0x215a   :  { %3900 = vmatprep.subr.mxu1 %v4370_v1 }
0x2227   :  { %v2076_v44 = vpop.f32.mrb[24].mxu1 }
0x2228   :  { %v4767_v45 = vadd.f32 %v2076_v44, %v4705_v37  ;;  %v3877_v47 = vpop.f32.mrb[25].mxu1 }
0x222a   :  { %v2081_v26 = vmul.f32 0.2, %v4767_v45  ;;  %v2161_v48 = vmul.f32 0.16666667, %v4767_v45 }
0x222c   :  { %v2082_v49 = vadd.f32 %v2081_v26, %v4434_v7  ;;  %v2162_v50 = vadd.f32 %v2161_v48, %v4434_v7 }
0x222e   :  { %v2083_v51 = vmul.f32 0.01, %v2082_v49  ;;  %v2163_v36 = vmul.f32 0.01, %v2162_v50 }
0x2230   :  { %v2084_v52 = vmax.f32 %v2082_v49, %v2083_v51  ;;  %v2164_v54 = vmax.f32 %v2162_v50, %v2163_v36  ;;  %v4833_v51 = vld [vmem:[#allocation2] sm:$0x1] }
0x2232   :  { %3887 = vmatmul.mubr.msk.f32.vlgmr.msra.gmra.mrb[26].mxu1 %vm63_vm4, %v2084_v52  ;;  %3898 = vmatmul.mubr.msk.f32.vlgmr.msra.gmra.mrb[22].mxu0 %vm63_vm4, %v2164_v54 }
0x2233   :  { %3901 = vmatpush3.msk.msra.mxu1 %vm160_vm6, %v4458_v25  ;;  %3902 = vmatprep.mubr.msk.f32.mxu1 %vm4369_vm0, %v4370_v1 }
0x2234   :  { %4132 = vmatpush3.bf16.msra.mxu0 %v4466_v31  ;;  %3913 = vmatprep.mubr.msk.f32.mxu0 %vm4369_vm0, %v4370_v1 }
0x2235   :  { %4133 = vmatprep.subr.bf16.mxu0 %v4368_v0  ;;  %3916 = vmatprep.subr.mxu1 %v4370_v1 }
0x2238   :  { %4136 = vmatpush3.bf16.msk.msra.mxu0 %vm4441_vm3, %v4470_v34 }
0x2239   :  { %4144 = vmatprep.subr.bf16.mxu0 %v4368_v0 }
0x2305   :  { %v2154_v7 = vpop.f32.mrb[26].mxu1  ;;  %v2234_v25 = vpop.f32.mrb[22].mxu0 }
0x2306   :  { %v2155_v37 = vadd.f32 %v2154_v7, %v4538_v18  ;;  %v2235_v56 = vadd.f32 %v2234_v25, %v4453_v12  ;;  %v3888_v57 = vpop.f32.mrb[27].mxu1  ;;  %v3899_v58 = vpop.f32.mrb[23].mxu0 }
0x2308   :  { %v2158_v59 = vmul.f32 0.01, %v2155_v37  ;;  %v2238_v46 = vmul.f32 0.01, %v2235_v56 }
0x230a   :  { %v2159_v60 = vmax.f32 %v2155_v37, %v2158_v59  ;;  %v2239_v63 = vmax.f32 %v2235_v56, %v2238_v46  ;;  %v4855_v59 = vld [vmem:[#allocation5 + $0x71] sm:$0x1] }
0x230c   :  { %2160 = vst.msk [vmem:[#allocation7 + $0x4] sm:$0x1] %vm144_vm5, %v2159_v60  ;;  %v2240_v2 = vmul.f32 35.0, %v2239_v63 }
0x230e   :  { %v2241_v6 = vsel %vm144_vm5, %v2240_v2, -inf }
0x230f   :  { %2242 = vmax.xlane.f32.xlu1 %v2241_v6 }
0x239c   :  { %v2243_v8 = vpop.xlane.xlu1 %2242 }
0x239d   :  { %v2244_v11 = vsub.f32 %v2240_v2, %v2243_v8 }
0x239f   :  { %v2245_v53 = vmul.f32 1.442695, %v2244_v11 }
0x23a1   :  { %4237 = vpow2.f32 %v2245_v53 }
0x23ab   :  { %v4238_v13 = vpop.eup %4237 }
0x23ac   :  { %v2247_v15 = vsel %vm144_vm5, %v4238_v13, 0.0 }
0x23ad   :  { %2248 = vadd.xlane.f32.xlu0 %v2247_v15 }
0x243a   :  { %v2249_v12 = vpop.xlane.xlu0 %2248 }
0x243b   :  { %4239 = vrcp.f32 %v2249_v12 }
0x2445   :  { %v4240_v17 = vpop.eup %4239 }
0x2446   :  { %v2251_v19 = vmul.f32 %v4240_v17, %v4238_v13 }
0x2448   :  { %3903 = vmatmul.mubr.msk.f32.vlgmr.msra.gmra.mrb[28].mxu1 %vm156_vm7, %v2251_v19 }
0x2449   :  { %3917 = vmatpush3.msk.msra.mxu1 %vm160_vm6, %v4492_v55  ;;  %3918 = vmatprep.mubr.msk.f32.mxu1 %vm4369_vm0, %v4370_v1 }
0x244a   :  { %4137 = vmatprep.subr.bf16.mxu1 %v4368_v0 }
0x251b   :  { %v2321_v20 = vpop.f32.mrb[28].mxu1 }
0x251c   :  { %v4800_v21 = vadd.f32 %v2321_v20, %v4738_v14  ;;  %v3904_v61 = vpop.f32.mrb[29].mxu1 }
0x251e   :  { %v2326_v22 = vmul.f32 0.16666667, %v4800_v21 }
0x2520   :  { %v2327_v23 = vadd.f32 %v2326_v22, %v4476_v35 }
0x2522   :  { %v2328_v24 = vmul.f32 0.01, %v2327_v23 }
0x2524   :  { %v2329_v27 = vmax.f32 %v2327_v23, %v2328_v24  ;;  %v4862_v23 = vld [vmem:[#allocation5] sm:$0x1f] }
0x2526   :  { %3914 = vmatmul.mubr.msk.f32.vlgmr.msra.gmra.mrb[24].mxu0 %vm63_vm4, %v2329_v27 }
0x2527   :  { %4146 = vmatpush3.bf16.msra.mxu0 %v4432_v5  ;;  %3940 = vmatprep.mubr.msk.f32.mxu0 %vm4369_vm0, %v4370_v1 }
0x2528   :  { %4147 = vmatprep.subr.bf16.mxu0 %v4368_v0 }
0x252b   :  { %4150 = vmatpush3.bf16.msk.msra.mxu0 %vm4441_vm3, %v4438_v9 }
0x252c   :  { %4151 = vmatprep.subr.bf16.mxu0 %v4368_v0 }
0x25f9   :  { %v2399_v55 = vpop.f32.mrb[24].mxu0 }
0x25fa   :  { %v2400_v35 = vadd.f32 %v2399_v55, %v4485_v41  ;;  %v3915_v14 = vpop.f32.mrb[25].mxu0 }
0x25fb   :  { %v4873_v14 = vld [vmem:[#allocation2 + $0x1] sm:$0x1] }
0x25fc   :  { %v2403_v4 = vmul.f32 0.01, %v2400_v35 }
0x25fe   :  { %v2404_v28 = vmax.f32 %v2400_v35, %v2403_v4 }
0x2600   :  { %2405 = vst.msk [vmem:[#allocation8 + $0x5] sm:$0x1] %vm144_vm5, %v2404_v28  ;;  %v2406_v29 = vmul.f32 35.0, %v2404_v28 }
0x2602   :  { %v2407_v30 = vsel %vm317_vm8, %v2406_v29, -inf }
0x2603   :  { %2408 = vmax.xlane.f32.xlu1 %v2407_v30  ;;  %v4885_v30 = vld [vmem:[#allocation5 + $0x72] sm:$0x1] }
0x2690   :  { %v2409_v32 = vpop.xlane.xlu1 %2408 }
0x2691   :  { %v2410_v33 = vsub.f32 %v2406_v29, %v2409_v32 }
0x2693   :  { %v2411_v38 = vmul.f32 1.442695, %v2410_v33 }
0x2695   :  { %4241 = vpow2.f32 %v2411_v38 }
0x269f   :  { %v4242_v16 = vpop.eup %4241 }
0x26a0   :  { %2414 = vrot.lane.b32.xlu1 %v4242_v16, %s4372_s1 }
0x2712   :  { %v2415_v39 = vpop.permute.xlu1 %2414 }
0x2713   :  { %v2417_v40 = vsel %vm144_vm5, %v2415_v39, 0.0 }
0x2714   :  { %2418 = vadd.xlane.f32.xlu0 %v2417_v40 }
0x27a1   :  { %v2419_v41 = vpop.xlane.xlu0 %2418 }
0x27a2   :  { %4243 = vrcp.f32 %v2419_v41 }
0x27ac   :  { %v4244_v42 = vpop.eup %4243 }
0x27ad   :  { %v2421_v43 = vmul.f32 %v4244_v42, %v4242_v16 }
0x27af   :  { %2423 = vrot.lane.b32.xlu0 %v2421_v43, %s4372_s1 }
0x2821   :  { %v2424_v44 = vpop.permute.xlu0 %2423 }
0x2822   :  { %3919 = vmatmul.mubr.msk.f32.vlgmr.msra.gmra.mrb[30].mxu1 %vm156_vm7, %v2424_v44 }
0x2823   :  { %4139 = vmatpush3.bf16.msra.mxu1 %v4507_v62  ;;  %3929 = vmatprep.mubr.msk.f32.mxu1 %vm4369_vm0, %v4370_v1 }
0x2824   :  { %4140 = vmatprep.subr.bf16.mxu1 %v4368_v0 }
0x2827   :  { %4143 = vmatpush3.bf16.msk.msra.mxu1 %vm4441_vm3, %v4511_v3 }
0x2828   :  { %3943 = vmatprep.subr.mxu1 %v4370_v1 }
0x28f5   :  { %v2493_v47 = vpop.f32.mrb[30].mxu1 }
0x28f6   :  { %v4829_v26 = vadd.f32 %v2493_v47, %v4767_v45  ;;  %v3920_v48 = vpop.f32.mrb[31].mxu1  ;;  %v4839_v45 = vld [vmem:[#allocation5 + $0x8] sm:$0x1f] }
0x28f8   :  { %v2498_v49 = vmul.f32 0.16666667, %v4829_v26  ;;  %v2578_v50 = vmul.f32 0.14285715, %v4829_v26 }
0x28fa   :  { %v2499_v36 = vadd.f32 %v4833_v51, %v2498_v49  ;;  %v2579_v52 = vadd.f32 %v4833_v51, %v2578_v50 }
0x28fc   :  { %v2500_v54 = vmul.f32 0.01, %v2499_v36  ;;  %v2580_v7 = vmul.f32 0.01, %v2579_v52 }
0x28fe   :  { %v2501_v25 = vmax.f32 %v2499_v36, %v2500_v54  ;;  %v2581_v37 = vmax.f32 %v2579_v52, %v2580_v7 }
0x2900   :  { %3930 = vmatmul.mubr.msk.f32.vlgmr.msra.gmra.mrb[32].mxu1 %vm63_vm4, %v2501_v25  ;;  %3941 = vmatmul.mubr.msk.f32.vlgmr.msra.gmra.mrb[26].mxu0 %vm63_vm4, %v2581_v37 }
0x2901   :  { %3944 = vmatpush3.msk.msra.mxu1 %vm160_vm6, %v4839_v45  ;;  %3945 = vmatprep.mubr.msk.f32.mxu1 %vm4369_vm0, %v4370_v1 }
0x2902   :  { %4153 = vmatpush3.bf16.msra.mxu0 %v4466_v31  ;;  %3956 = vmatprep.mubr.msk.f32.mxu0 %vm4369_vm0, %v4370_v1 }
0x2903   :  { %4154 = vmatprep.subr.bf16.mxu0 %v4368_v0  ;;  %3959 = vmatprep.subr.mxu1 %v4370_v1 }
0x2906   :  { %4157 = vmatpush3.bf16.msk.msra.mxu0 %vm4441_vm3, %v4470_v34 }
0x2907   :  { %4165 = vmatprep.subr.bf16.mxu0 %v4368_v0 }
0x29d3   :  { %v2571_v56 = vpop.f32.mrb[32].mxu1  ;;  %v2651_v57 = vpop.f32.mrb[26].mxu0 }
0x29d4   :  { %v2572_v58 = vadd.f32 %v2571_v56, %v4538_v18  ;;  %v2652_v46 = vadd.f32 %v4855_v59, %v2651_v57  ;;  %v3931_v60 = vpop.f32.mrb[33].mxu1  ;;  %v3942_v63 = vpop.f32.mrb[27].mxu0 }
0x29d6   :  { %v2575_v2 = vmul.f32 0.01, %v2572_v58  ;;  %v2655_v6 = vmul.f32 0.01, %v2652_v46 }
0x29d8   :  { %v2576_v8 = vmax.f32 %v2572_v58, %v2575_v2  ;;  %v2656_v11 = vmax.f32 %v2652_v46, %v2655_v6  ;;  %v4923_v2 = vld [vmem:[#allocation5 + $0x70] sm:$0x1] }
0x29da   :  { %2577 = vst.msk [vmem:[#allocation7 + $0x5] sm:$0x1] %vm144_vm5, %v2576_v8  ;;  %v2657_v53 = vmul.f32 35.0, %v2656_v11 }
0x29dc   :  { %v2658_v13 = vsel %vm144_vm5, %v2657_v53, -inf }
0x29dd   :  { %2659 = vmax.xlane.f32.xlu1 %v2658_v13 }
0x2a6a   :  { %v2660_v15 = vpop.xlane.xlu1 %2659 }
0x2a6b   :  { %v2661_v12 = vsub.f32 %v2657_v53, %v2660_v15 }
0x2a6d   :  { %v2662_v17 = vmul.f32 1.442695, %v2661_v12 }
0x2a6f   :  { %4245 = vpow2.f32 %v2662_v17 }
0x2a79   :  { %v4246_v18 = vpop.eup %4245 }
0x2a7a   :  { %v2664_v19 = vsel %vm144_vm5, %v4246_v18, 0.0 }
0x2a7b   :  { %2665 = vadd.xlane.f32.xlu0 %v2664_v19 }
0x2b08   :  { %v2666_v20 = vpop.xlane.xlu0 %2665 }
0x2b09   :  { %4247 = vrcp.f32 %v2666_v20 }
0x2b13   :  { %v4248_v61 = vpop.eup %4247 }
0x2b14   :  { %v2668_v22 = vmul.f32 %v4248_v61, %v4246_v18 }
0x2b16   :  { %3946 = vmatmul.mubr.msk.f32.vlgmr.msra.gmra.mrb[34].mxu1 %vm156_vm7, %v2668_v22 }
0x2b17   :  { %3960 = vmatpush3.msk.msra.mxu1 %vm160_vm6, %v4862_v23  ;;  %3961 = vmatprep.mubr.msk.f32.mxu1 %vm4369_vm0, %v4370_v1 }
0x2b18   :  { %4158 = vmatprep.subr.bf16.mxu1 %v4368_v0 }
0x2be9   :  { %v2738_v24 = vpop.f32.mrb[34].mxu1 }
0x2bea   :  { %v4870_v27 = vadd.f32 %v2738_v24, %v4800_v21  ;;  %v3947_v55 = vpop.f32.mrb[35].mxu1 }
0x2bec   :  { %v2743_v35 = vmul.f32 0.14285715, %v4870_v27 }
0x2bee   :  { %v2744_v4 = vadd.f32 %v4873_v14, %v2743_v35 }
0x2bf0   :  { %v2745_v28 = vmul.f32 0.01, %v2744_v4 }
0x2bf2   :  { %v2746_v29 = vmax.f32 %v2744_v4, %v2745_v28 }
0x2bf4   :  { %3957 = vmatmul.mubr.msk.f32.vlgmr.msra.gmra.mrb[28].mxu0 %vm63_vm4, %v2746_v29 }
0x2bf5   :  { %4167 = vmatpush3.bf16.msra.mxu0 %v4432_v5  ;;  %3983 = vmatprep.mubr.msk.f32.mxu0 %vm4369_vm0, %v4370_v1 }
0x2bf6   :  { %4168 = vmatprep.subr.bf16.mxu0 %v4368_v0 }
0x2bf9   :  { %4171 = vmatpush3.bf16.msk.msra.mxu0 %vm4441_vm3, %v4438_v9 }
0x2bfa   :  { %4172 = vmatprep.subr.bf16.mxu0 %v4368_v0 }
0x2cc7   :  { %v2816_v21 = vpop.f32.mrb[28].mxu0 }
0x2cc8   :  { %v2817_v32 = vadd.f32 %v4885_v30, %v2816_v21  ;;  %v3958_v33 = vpop.f32.mrb[29].mxu0 }
0x2cca   :  { %v2820_v38 = vmul.f32 0.01, %v2817_v32 }
0x2ccc   :  { %v2821_v16 = vmax.f32 %v2817_v32, %v2820_v38 }
0x2cce   :  { %2822 = vst.msk [vmem:[#allocation8 + $0x6] sm:$0x1] %vm144_vm5, %v2821_v16  ;;  %v2823_v5 = vmul.f32 35.0, %v2821_v16 }
0x2cd0   :  { %v2824_v39 = vsel %vm317_vm8, %v2823_v5, -inf }
0x2cd1   :  { %2825 = vmax.xlane.f32.xlu1 %v2824_v39 }
0x2d5e   :  { %v2826_v40 = vpop.xlane.xlu1 %2825 }
0x2d5f   :  { %v2827_v41 = vsub.f32 %v2823_v5, %v2826_v40 }
0x2d61   :  { %v2828_v42 = vmul.f32 1.442695, %v2827_v41 }
0x2d63   :  { %4249 = vpow2.f32 %v2828_v42 }
0x2d6d   :  { %v4250_v9 = vpop.eup %4249 }
0x2d6e   :  { %2831 = vrot.lane.b32.xlu1 %v4250_v9, %s4372_s1 }
0x2de0   :  { %v2832_v43 = vpop.permute.xlu1 %2831 }
0x2de1   :  { %v2834_v44 = vsel %vm144_vm5, %v2832_v43, 0.0 }
0x2de2   :  { %2835 = vadd.xlane.f32.xlu0 %v2834_v44 }
0x2e6f   :  { %v2836_v47 = vpop.xlane.xlu0 %2835 }
0x2e70   :  { %4251 = vrcp.f32 %v2836_v47 }
0x2e7a   :  { %v4252_v48 = vpop.eup %4251 }
0x2e7b   :  { %v2838_v49 = vmul.f32 %v4252_v48, %v4250_v9 }
0x2e7d   :  { %2840 = vrot.lane.b32.xlu0 %v2838_v49, %s4372_s1 }
0x2eef   :  { %v2841_v50 = vpop.permute.xlu0 %2840 }
0x2ef0   :  { %3962 = vmatmul.mubr.msk.f32.vlgmr.msra.gmra.mrb[36].mxu1 %vm156_vm7, %v2841_v50 }
0x2ef1   :  { %4160 = vmatpush3.bf16.msra.mxu1 %v4507_v62  ;;  %3972 = vmatprep.mubr.msk.f32.mxu1 %vm4369_vm0, %v4370_v1 }
0x2ef2   :  { %4161 = vmatprep.subr.bf16.mxu1 %v4368_v0 }
0x2ef5   :  { %4164 = vmatpush3.bf16.msk.msra.mxu1 %vm4441_vm3, %v4511_v3 }
0x2ef6   :  { %3986 = vmatprep.subr.mxu1 %v4370_v1 }
0x2fc3   :  { %v2910_v36 = vpop.f32.mrb[36].mxu1 }
0x2fc4   :  { %v4903_v52 = vadd.f32 %v2910_v36, %v4829_v26  ;;  %v3963_v54 = vpop.f32.mrb[37].mxu1 }
0x2fc6   :  { %v2915_v7 = vmul.f32 0.14285715, %v4903_v52  ;;  %v2995_v25 = vmul.f32 0.125, %v4903_v52 }
0x2fc8   :  { %v2916_v37 = vadd.f32 %v4833_v51, %v2915_v7  ;;  %v2996_v56 = vadd.f32 %v4833_v51, %v2995_v25 }
0x2fca   :  { %v2917_v57 = vmul.f32 0.01, %v2916_v37  ;;  %v2997_v58 = vmul.f32 0.01, %v2996_v56 }
0x2fcc   :  { %v2918_v46 = vmax.f32 %v2916_v37, %v2917_v57  ;;  %v2998_v60 = vmax.f32 %v2996_v56, %v2997_v58 }
0x2fce   :  { %3973 = vmatmul.mubr.msk.f32.vlgmr.msra.gmra.mrb[38].mxu1 %vm63_vm4, %v2918_v46  ;;  %3984 = vmatmul.mubr.msk.f32.vlgmr.msra.gmra.mrb[30].mxu0 %vm63_vm4, %v2998_v60 }
0x2fcf   :  { %3987 = vmatpush3.msk.msra.mxu1 %vm160_vm6, %v4839_v45  ;;  %3988 = vmatprep.mubr.msk.f32.mxu1 %vm4369_vm0, %v4370_v1 }
0x2fd0   :  { %4174 = vmatpush3.bf16.msra.mxu0 %v4466_v31  ;;  %3999 = vmatprep.mubr.msk.f32.mxu0 %vm4369_vm0, %v4370_v1 }
0x2fd1   :  { %4175 = vmatprep.subr.bf16.mxu0 %v4368_v0  ;;  %4002 = vmatprep.subr.mxu1 %v4370_v1 }
0x2fd4   :  { %4178 = vmatpush3.bf16.msk.msra.mxu0 %vm4441_vm3, %v4470_v34 }
0x30a1   :  { %v2988_v26 = vpop.f32.mrb[38].mxu1  ;;  %v3068_v63 = vpop.f32.mrb[30].mxu0 }
0x30a2   :  { %v2989_v45 = vadd.f32 %v4923_v2, %v2988_v26  ;;  %v3069_v6 = vadd.f32 %v4855_v59, %v3068_v63  ;;  %v3974_v31 = vpop.f32.mrb[39].mxu1  ;;  %v3985_v8 = vpop.f32.mrb[31].mxu0 }
0x30a4   :  { %v2992_v11 = vmul.f32 0.01, %v2989_v45  ;;  %v3072_v53 = vmul.f32 0.01, %v3069_v6 }
0x30a6   :  { %v2993_v13 = vmax.f32 %v2989_v45, %v2992_v11  ;;  %v3073_v15 = vmax.f32 %v3069_v6, %v3072_v53 }
0x30a8   :  { %2994 = vst.msk [vmem:[#allocation7 + $0x6] sm:$0x1] %vm144_vm5, %v2993_v13  ;;  %v3074_v12 = vmul.f32 35.0, %v3073_v15 }
0x30aa   :  { %v3075_v17 = vsel %vm144_vm5, %v3074_v12, -inf }
0x30ab   :  { %3076 = vmax.xlane.f32.xlu1 %v3075_v17 }
0x3138   :  { %v3077_v34 = vpop.xlane.xlu1 %3076 }
0x3139   :  { %v3078_v18 = vsub.f32 %v3074_v12, %v3077_v34 }
0x313b   :  { %v3079_v19 = vmul.f32 1.442695, %v3078_v18 }
0x313d   :  { %4253 = vpow2.f32 %v3079_v19 }
0x3147   :  { %v4254_v20 = vpop.eup %4253 }
0x3148   :  { %v3081_v61 = vsel %vm144_vm5, %v4254_v20, 0.0 }
0x3149   :  { %3082 = vadd.xlane.f32.xlu0 %v3081_v61 }
0x31d6   :  { %v3083_v59 = vpop.xlane.xlu0 %3082 }
0x31d7   :  { %4255 = vrcp.f32 %v3083_v59 }
0x31e1   :  { %v4256_v22 = vpop.eup %4255 }
0x31e2   :  { %v3085_v24 = vmul.f32 %v4256_v22, %v4254_v20 }
0x31e4   :  { %3989 = vmatmul.mubr.msk.f32.vlgmr.msra.gmra.mrb[40].mxu1 %vm156_vm7, %v3085_v24 }
0x31e5   :  { %4003 = vmatpush3.msk.msra.mxu1 %vm160_vm6, %v4862_v23  ;;  %4004 = vmatprep.mubr.msk.f32.mxu1 %vm4369_vm0, %v4370_v1 }
0x31e6   :  { %4179 = vmatprep.subr.bf16.mxu1 %v4368_v0 }
0x32b7   :  { %v3155_v55 = vpop.f32.mrb[40].mxu1 }
0x32b8   :  { %v3159_v35 = vadd.f32 %v3155_v55, %v4870_v27  ;;  %v3990_v4 = vpop.f32.mrb[41].mxu1 }
0x32ba   :  { %v3160_v28 = vmul.f32 0.125, %v3159_v35 }
0x32bc   :  { %v3161_v29 = vadd.f32 %v4873_v14, %v3160_v28 }
0x32be   :  { %v3162_v21 = vmul.f32 0.01, %v3161_v29 }
0x32c0   :  { %v3163_v32 = vmax.f32 %v3161_v29, %v3162_v21 }
0x32c2   :  { %4000 = vmatmul.mubr.msk.f32.vlgmr.msra.gmra.mrb[32].mxu0 %vm63_vm4, %v3163_v32 }
0x3395   :  { %v3233_v33 = vpop.f32.mrb[32].mxu0 }
0x3396   :  { %v3234_v38 = vadd.f32 %v4885_v30, %v3233_v33  ;;  %v4001_v23 = vpop.f32.mrb[33].mxu0 }
0x3398   :  { %v3237_v16 = vmul.f32 0.01, %v3234_v38 }
0x339a   :  { %v3238_v5 = vmax.f32 %v3234_v38, %v3237_v16 }
0x339c   :  { %3239 = vst.msk [vmem:[#allocation8 + $0x7] sm:$0x1] %vm144_vm5, %v3238_v5  ;;  %v3240_v39 = vmul.f32 35.0, %v3238_v5 }
0x339e   :  { %v3241_v40 = vsel %vm317_vm8, %v3240_v39, -inf }
0x339f   :  { %3242 = vmax.xlane.f32.xlu1 %v3241_v40 }
0x342c   :  { %v3243_v27 = vpop.xlane.xlu1 %3242 }
0x342d   :  { %v3244_v41 = vsub.f32 %v3240_v39, %v3243_v27 }
0x342f   :  { %v3245_v42 = vmul.f32 1.442695, %v3244_v41 }
0x3431   :  { %4257 = vpow2.f32 %v3245_v42 }
0x343b   :  { %v4258_v14 = vpop.eup %4257 }
0x343c   :  { %3248 = vrot.lane.b32.xlu1 %v4258_v14, %s4372_s1 }
0x34ae   :  { %v3249_v9 = vpop.permute.xlu1 %3248 }
0x34af   :  { %v3251_v43 = vsel %vm144_vm5, %v3249_v9, 0.0 }
0x34b0   :  { %3252 = vadd.xlane.f32.xlu0 %v3251_v43 }
0x353d   :  { %v3253_v30 = vpop.xlane.xlu0 %3252 }
0x353e   :  { %4259 = vrcp.f32 %v3253_v30 }
0x3548   :  { %v4260_v44 = vpop.eup %4259 }
0x3549   :  { %v3255_v47 = vmul.f32 %v4260_v44, %v4258_v14 }
0x354b   :  { %3257 = vrot.lane.b32.xlu0 %v3255_v47, %s4372_s1 }
0x35bd   :  { %v3258_v48 = vpop.permute.xlu0 %3257 }
0x35be   :  { %4005 = vmatmul.mubr.msk.f32.vlgmr.msra.gmra.mrb[42].mxu1 %vm156_vm7, %v3258_v48 }
0x35bf   :  { %4181 = vmatpush3.bf16.msra.mxu1 %v4507_v62  ;;  %4015 = vmatprep.mubr.msk.f32.mxu1 %vm4369_vm0, %v4370_v1 }
0x35c0   :  { %4182 = vmatprep.subr.bf16.mxu1 %v4368_v0 }
0x35c3   :  { %4185 = vmatpush3.bf16.msk.msra.mxu1 %vm4441_vm3, %v4511_v3 }
0x3691   :  { %v3327_v49 = vpop.f32.mrb[42].mxu1 }
0x3692   :  { %v3331_v50 = vadd.f32 %v3327_v49, %v4903_v52  ;;  %v4006_v36 = vpop.f32.mrb[43].mxu1 }
0x3694   :  { %v3332_v54 = vmul.f32 0.125, %v3331_v50 }
0x3696   :  { %v3333_v7 = vadd.f32 %v4833_v51, %v3332_v54 }
0x3698   :  { %v3334_v25 = vmul.f32 0.01, %v3333_v7 }
0x369a   :  { %v3335_v37 = vmax.f32 %v3333_v7, %v3334_v25 }
0x369c   :  { %4016 = vmatmul.mubr.msk.f32.vlgmr.msra.gmra.mrb[44].mxu1 %vm63_vm4, %v3335_v37 }
0x369d   :  { %4323 = shalt.err (!%p4320_p6)
}
0x369e   :  { %s4324_s15 = scalar_lea.hbm %s4985_s3, 128 }
0x369f   :  { %p4325_p7 = scmp.ne.s32.totalorder %s4985_s3, %s4324_s15  ;;  %p4328_p8 = scmp.lt.u32.totalorder %s4324_s15, %s4985_s3 }
0x36a1   :  { %p4330_p9 = pnand %p4328_p8, %p4325_p7 }
0x36a3   :  { %4333 = shalt.err (!%p4330_p9)
}
0x36a4   :  { %3431 = dma.vmem_to_hbm [thread:$0]  %s3429_s11, 128, %s4985_s3, [#allocation9]  }
0x36a5   :  { %s4374_s22 = smov [#allocation7]  }
0x36a6   :  { %s3418_s23 = sshll.u32 %s4374_s22, 4  ;;  %s3419_s23 = int_to_ptr.vmem [resolvable:$true] %s3418_s23 }
0x36a7   :  { %s4334_s24 = scalar_lea.vmem %s3419_s23, 128  ;;  %p4339_p11 = scmp.lt.s32.totalorder %s3419_s23, %s3419_s23 }
0x36a8   :  { %p4335_p10 = scmp.ne.s32.totalorder %s3419_s23, %s4334_s24  ;;  %p4340_p12 = scmp.lt.s32.totalorder %s4334_s24, %s4334_s24 }
0x36aa   :  { %p4341_p13 = por %p4340_p12, %p4339_p11 }
0x36ac   :  { %p4342_p0 = pnand %p4341_p13, %p4335_p10 }
0x376f   :  { %v3405_v0 = vpop.f32.mrb[44].mxu1 }
0x3770   :  { %v3406_v1 = vadd.f32 %v4923_v2, %v3405_v0  ;;  %v4017_v10 = vpop.f32.mrb[45].mxu1 }
0x3772   :  { %v3409_v62 = vmul.f32 0.01, %v3406_v1 }
0x3774   :  { %v3410_v3 = vmax.f32 %v3406_v1, %v3409_v62 }
0x3776   :  { %3411 = vst.msk [vmem:[#allocation7 + $0x7] sm:$0x1] %vm144_vm5, %v3410_v3 }
0x3777   :  { %4345 = shalt.err (!%p4342_p0)
}
0x3778   :  { %s4346_s26 = scalar_lea.hbm %s4984_s2, 128 }
0x3779   :  { %p4347_p1 = scmp.ne.s32.totalorder %s4984_s2, %s4346_s26  ;;  %p4350_p2 = scmp.lt.u32.totalorder %s4346_s26, %s4984_s2 }
0x377b   :  { %p4352_p3 = pnand %p4350_p2, %p4347_p1 }
0x377d   :  { %4355 = shalt.err (!%p4352_p3)
}
0x377e   :  { %3421 = dma.vmem_to_hbm [thread:$0]  %s3419_s23, 128, %s4984_s2, [#allocation4]  }
0x377f   :  { %4360 = dma.done.wait [#allocation4], 128  }
0x3780   :  { %4361 = vsyncadd [#allocation4], 4294967168 }
0x3781   :  { %4362 = dma.done.wait [#allocation9], 128  }
0x3782   :  { %4363 = vsyncadd [#allocation9], 4294967168 }
0x3783   :  { %3438 = vsyncpa [#allocation3], 1 }
0x3784   :  { %3439 = vsyncpa [#allocation6], 1 }
0x3785   :  { %3440 = vsyncpa [#allocation4], 1 }
0x3786   :  { %3441 = vsyncpa [#allocation9], 1 }

</bundles_post_ra>
